<compile_context>
chip_gen: v7x
topology: tpu7x:2x2x1
jax: 0.10.0
libtpu: 0.0.40
codegen_flags: <defaults>
</compile_context>

<pallas_src>
import functools

import jax
import jax.numpy as jnp
from jax import lax
from jax.experimental import pallas as pl
from jax.experimental.pallas import tpu as pltpu

# Module-level constants from the reference PyTorch file.
BLOCK_SIZE = 8      # max sequence length (tril buffer size)
N_EMBED = 32        # embedding dim
HEAD_SIZE = 16      # head size (nn.Linear(n_embed, head_size))


def _head_kernel(x_ref, w_ref, bias_ref, o_ref, *, head_size):
    # x_ref:    (N, C)   N = Bb*T flattened (batch, time) rows of this grid step
    # w_ref:    (C, 3H)  fused [Wq * C**-0.5 | Wk | Wv] projection weights
    # bias_ref: (N, N)   block-diagonal causal additive bias (0 / -inf)
    # o_ref:    (N, H)
    H = head_size

    # Single fused QKV projection on the MXU: (N, C) @ (C, 3H).
    qkv = jnp.dot(x_ref[...], w_ref[...], preferred_element_type=jnp.float32)

    q = qkv[:, 0:H]            # 1/sqrt(C) scale already folded into Wq columns
    k = qkv[:, H:2 * H]
    v = qkv[:, 2 * H:3 * H]

    # Dense (N, N) scores in one matmul (contract on H).  Cross-batch and
    # non-causal entries are killed by the -inf additive bias below.
    scores = lax.dot_general(q, k, (((1,), (1,)), ((), ())),
                             preferred_element_type=jnp.float32)
    scores = scores + bias_ref[...]

    # Numerically stable softmax over fully lane-dense N-wide rows.  The row
    # max is always finite (the causal diagonal is never masked), so
    # exp(-inf - m) == 0 exactly on masked entries.  Divide goes through the
    # otherwise idle EUP reciprocal, refined by one Newton step.
    m = jnp.max(scores, axis=-1, keepdims=True)
    e = jnp.exp(scores - m)
    denom = jnp.sum(e, axis=-1, keepdims=True)
    inv = pl.reciprocal(denom, approx=True)
    inv = inv * (2.0 - denom * inv)
    weights = e * inv                                              # (N, N)

    out = jnp.dot(weights, v, preferred_element_type=jnp.float32)  # (N, H)
    # TODO(synk): fuse >=8 heads so the stored last dim is >=128 lanes; a
    # single Head only writes H=16 lanes (masked vst), small at this size.
    o_ref[...] = out.astype(o_ref.dtype)


def _pick_block_b(B, max_bb):
    """Largest divisor of B that does not exceed max_bb."""
    bb = min(B, max_bb)
    while B % bb:
        bb -= 1
    return bb


def head_forward(x, wk, wq, wv, *, max_block_b=32):
    """x: (B, T, C) float32; wk/wq/wv: (H, C) PyTorch-Linear-style weights."""
    B, T, C = x.shape
    H = wk.shape[0]
    Bb = _pick_block_b(B, max_block_b)   # default: Bb = B -> grid=(1,)
    N = Bb * T
    scale = float(C) ** -0.5             # embedding_dim ** -0.5, as in PyTorch

    # Fuse the three projection weights once and fold the scale into Wq.
    w_qkv = jnp.concatenate([wq.T * scale, wk.T, wv.T], axis=1)   # (C, 3H)

    # Block-diagonal causal additive bias over one (Bb*T)-row chunk:
    # 0 where (same batch element) & (key pos <= query pos), -inf elsewhere.
    # Reproduces the module's tril[:T, :T] masked_fill semantics per batch.
    row = jnp.arange(N)
    bidx = row // T
    pos = row % T
    allowed = (bidx[:, None] == bidx[None, :]) & (pos[:, None] >= pos[None, :])
    bias = jnp.where(allowed, jnp.float32(0.0), jnp.float32(-jnp.inf))  # (N, N)

    # Layout-preserving flatten so the kernel block is a plain (rows, C) tile.
    x2d = x.reshape(B * T, C)

    cost = pl.CostEstimate(
        flops=int(2 * (B * T) * C * 3 * H + 4 * (B * T) * N * H),
        transcendentals=int((B * T) * (N + 1)),
        bytes_accessed=int((x2d.size + w_qkv.size
                            + (B // Bb) * bias.size + B * T * H) * 4),
    )

    kernel = functools.partial(_head_kernel, head_size=H)

    out2d = pl.pallas_call(
        kernel,
        out_shape=jax.ShapeDtypeStruct((B * T, H), x.dtype),
        grid_spec=pltpu.PrefetchScalarGridSpec(
            num_scalar_prefetch=0,
            grid=(B // Bb,),
            in_specs=[
                pl.BlockSpec((N, C), lambda b: (b, 0)),
                pl.BlockSpec((C, 3 * H), lambda b: (0, 0)),
                pl.BlockSpec((N, N), lambda b: (0, 0)),
            ],
            out_specs=pl.BlockSpec((N, H), lambda b: (b, 0)),
        ),
        compiler_params=pltpu.CompilerParams(
            dimension_semantics=("parallel",),
        ),
        cost_estimate=cost,
    )(x2d, w_qkv, bias)

    return out2d.reshape(B, T, H)


def head_reference(x, wk, wq, wv):
    """Pure-JAX reference replicating the PyTorch forward exactly."""
    B, T, C = x.shape
    k = x @ wk.T
    q = x @ wq.T
    v = x @ wv.T
    w = (q @ jnp.swapaxes(k, -2, -1)) * (C ** -0.5)
    tril = jnp.tril(jnp.ones((BLOCK_SIZE, BLOCK_SIZE)))[:T, :T]
    w = jnp.where(tril == 0, -jnp.inf, w)
    w = jax.nn.softmax(w, axis=-1)
    return w @ v


if __name__ == "__main__":
    key = jax.random.PRNGKey(0)
    kx, kk, kq, kv = jax.random.split(key, 4)

    B, T, C, H = 32, BLOCK_SIZE, N_EMBED, HEAD_SIZE

    x = jax.random.normal(kx, (B, T, C), dtype=jnp.float32)
    # nn.Linear(n_embed, head_size, bias=False) weight shape: (head_size, n_embed)
    bound = 1.0 / (C ** 0.5)
    wk = jax.random.uniform(kk, (H, C), jnp.float32, -bound, bound)
    wq = jax.random.uniform(kq, (H, C), jnp.float32, -bound, bound)
    wv = jax.random.uniform(kv, (H, C), jnp.float32, -bound, bound)

    out = jax.block_until_ready(head_forward(x, wk, wq, wv))
    with jax.default_matmul_precision("float32"):
        ref = jax.block_until_ready(head_reference(x, wk, wq, wv))

    assert out.shape == (B, T, H), out.shape
    max_err = float(jnp.max(jnp.abs(out - ref)))
    assert jnp.allclose(out, ref, atol=5e-5, rtol=5e-5), max_err

    print("KERNEL_OK")
</pallas_src>

<mosaic_0001>
module attributes {stable_mosaic.version = 11 : i64} {
  func.func @_head_kernel(%arg0: i32, %arg1: memref<256x32xf32, #tpu.memory_space<vmem>>, %arg2: memref<32x48xf32, #tpu.memory_space<vmem>>, %arg3: memref<256x256xf32, #tpu.memory_space<vmem>>, %arg4: memref<256x16xf32, #tpu.memory_space<vmem>>) attributes {dimension_semantics = [#tpu.dimension_semantics<parallel>], iteration_bounds = array<i64: 1>, scalar_prefetch = 0 : i64, scratch_operands = 0 : i64, tpu.core_type = #tpu.core_type<tc>, window_params = [{transform_indices = @transform_0, window_bounds = array<i64: 256, 32>}, {pipeline_mode = #tpu.pipeline_mode<synchronous>, transform_indices = @transform_1, window_bounds = array<i64: 32, 48>}, {pipeline_mode = #tpu.pipeline_mode<synchronous>, transform_indices = @transform_2, window_bounds = array<i64: 256, 256>}, {transform_indices = @transform_3, window_bounds = array<i64: 256, 16>}]} {
    %c0 = arith.constant 0 : index
    %c0_0 = arith.constant 0 : index
    %0 = vector.load %arg1[%c0, %c0_0] : memref<256x32xf32, #tpu.memory_space<vmem>>, vector<256x32xf32>
    %c0_1 = arith.constant 0 : index
    %c0_2 = arith.constant 0 : index
    %1 = vector.load %arg2[%c0_1, %c0_2] : memref<32x48xf32, #tpu.memory_space<vmem>>, vector<32x48xf32>
    %cst = arith.constant dense<0.000000e+00> : vector<256x48xf32>
    %2 = tpu.matmul %0, %1, %cst {dimension_numbers = #tpu.dot_dimension_numbers<[1], [0], [0], [1], [0, 0, 1, 1], [], []>} : vector<256x32xf32>, vector<32x48xf32>, vector<256x48xf32> -> vector<256x48xf32>
    %3 = vector.extract_strided_slice %2 {offsets = [0, 0], sizes = [256, 16], strides = [1, 1]} : vector<256x48xf32> to vector<256x16xf32>
    %4 = vector.extract_strided_slice %2 {offsets = [0, 16], sizes = [256, 16], strides = [1, 1]} : vector<256x48xf32> to vector<256x16xf32>
    %5 = vector.extract_strided_slice %2 {offsets = [0, 32], sizes = [256, 16], strides = [1, 1]} : vector<256x48xf32> to vector<256x16xf32>
    %cst_3 = arith.constant dense<0.000000e+00> : vector<256x256xf32>
    %6 = tpu.matmul %3, %4, %cst_3 {dimension_numbers = #tpu.dot_dimension_numbers<[1], [1], [0], [0], [0, 0, 1, 0], [], []>} : vector<256x16xf32>, vector<256x16xf32>, vector<256x256xf32> -> vector<256x256xf32>
    %c0_4 = arith.constant 0 : index
    %c0_5 = arith.constant 0 : index
    %7 = vector.load %arg3[%c0_4, %c0_5] : memref<256x256xf32, #tpu.memory_space<vmem>>, vector<256x256xf32>
    %8 = arith.addf %6, %7 : vector<256x256xf32>
    %cst_6 = arith.constant dense<0xFF800000> : vector<256xf32>
    %9 = vector.multi_reduction <maximumf>, %8, %cst_6 [1] : vector<256x256xf32> to vector<256xf32>
    %10 = vector.shape_cast %9 : vector<256xf32> to vector<256x1xf32>
    %11 = vector.broadcast %10 : vector<256x1xf32> to vector<256x256xf32>
    %12 = arith.subf %8, %11 : vector<256x256xf32>
    %13 = math.exp %12 : vector<256x256xf32>
    %cst_7 = arith.constant dense<0.000000e+00> : vector<256xf32>
    %14 = vector.multi_reduction <add>, %13, %cst_7 [1] : vector<256x256xf32> to vector<256xf32>
    %15 = vector.shape_cast %14 : vector<256xf32> to vector<256x1xf32>
    %16 = tpu.reciprocal %15 {approx = true} : vector<256x1xf32> -> vector<256x1xf32>
    %17 = arith.mulf %15, %16 : vector<256x1xf32>
    %cst_8 = arith.constant 2.000000e+00 : f32
    %18 = vector.broadcast %cst_8 : f32 to vector<256x1xf32>
    %19 = arith.subf %18, %17 : vector<256x1xf32>
    %20 = arith.mulf %16, %19 : vector<256x1xf32>
    %21 = vector.broadcast %20 : vector<256x1xf32> to vector<256x256xf32>
    %22 = arith.mulf %13, %21 : vector<256x256xf32>
    %cst_9 = arith.constant dense<0.000000e+00> : vector<256x16xf32>
    %23 = tpu.matmul %22, %5, %cst_9 {dimension_numbers = #tpu.dot_dimension_numbers<[1], [0], [0], [1], [0, 0, 1, 1], [], []>} : vector<256x256xf32>, vector<256x16xf32>, vector<256x16xf32> -> vector<256x16xf32>
    %c0_10 = arith.constant 0 : index
    %c0_11 = arith.constant 0 : index
    %24 = vector.load %arg4[%c0_10, %c0_11] : memref<256x16xf32, #tpu.memory_space<vmem>>, vector<256x16xf32>
    tpu.vector_store %arg4[%c0_10, %c0_11], %23 {strides = array<i32>} : memref<256x16xf32, #tpu.memory_space<vmem>>, vector<256x16xf32>,
    return
  }
  func.func @transform_0(%arg0: i32) -> (i32, i32) {
    %c0_i32 = arith.constant 0 : i32
    %c0_i32_0 = arith.constant 0 : i32
    return %arg0, %c0_i32 : i32, i32
  }
  func.func @transform_1(%arg0: i32) -> (i32, i32) {
    %c0_i32 = arith.constant 0 : i32
    %c0_i32_0 = arith.constant 0 : i32
    %c0_i32_1 = arith.constant 0 : i32
    return %c0_i32, %c0_i32_0 : i32, i32
  }
  func.func @transform_2(%arg0: i32) -> (i32, i32) {
    %c0_i32 = arith.constant 0 : i32
    %c0_i32_0 = arith.constant 0 : i32
    %c0_i32_1 = arith.constant 0 : i32
    return %c0_i32, %c0_i32_0 : i32, i32
  }
  func.func @transform_3(%arg0: i32) -> (i32, i32) {
    %c0_i32 = arith.constant 0 : i32
    %c0_i32_0 = arith.constant 0 : i32
    return %arg0, %c0_i32 : i32, i32
  }
}

</mosaic_0001>

<bundles_post_ra>
// kernel: tpu_custom_call.1
= control target key start
LH: loop header
LB: loop body
LE: loop exit
PB: predicated region body
PF: predicated region fallthrough
CT: control target
= control target key end

     0   :  { %8 = vsyncpa [#allocation3], 0  ;;  %s2668_s12 = smov [#allocation2]   ;;  %s3888_s0 = inlined_call_operand.vmem [shape: f32[256,32], index: 0, kind: input, shape index: {}]   ;;  %s3889_s1 = inlined_call_operand.vmem [shape: f32[32,48], index: 1, kind: input, shape index: {}]   ;;  %s3890_s2 = inlined_call_operand.hbm [shape: f32[256,256], index: 2, kind: input, shape index: {}]   ;;  %s3891_s3 = inlined_call_operand.vmem [shape: f32[256,16], index: 3, kind: output, shape index: {}]  }
   0x1   :  { %s18_s13 = sshll.u32 %s2668_s12, 4  ;;  %s2644_s16 = scalar_lea.hbm %s3890_s2, 8192  ;;  %s19_s13 = int_to_ptr.vmem [resolvable:$true] %s18_s13 }
   0x2   :  { %p2645_p0 = scmp.ne.s32.totalorder %s3890_s2, %s2644_s16  ;;  %p2648_p1 = scmp.lt.u32.totalorder %s2644_s16, %s3890_s2 }
   0x4   :  { %p2650_p2 = pnand %p2648_p1, %p2645_p0 }
   0x6   :  { %2653 = shalt.err (!%p2650_p2)
}
   0x7   :  { %s2654_s21 = scalar_lea.vmem %s19_s13, 8192  ;;  %p2659_p4 = scmp.lt.s32.totalorder %s19_s13, %s19_s13 }
   0x8   :  { %p2655_p3 = scmp.ne.s32.totalorder %s19_s13, %s2654_s21  ;;  %p2660_p5 = scmp.lt.s32.totalorder %s2654_s21, %s2654_s21 }
   0xa   :  { %p2661_p6 = por %p2660_p5, %p2659_p4 }
   0xc   :  { %p2662_p7 = pnand %p2661_p6, %p2655_p3 }
   0xe   :  { %2665 = shalt.err (!%p2662_p7)
}
   0xf   :  { %s2669_s22 = smov 256   ;;  %s2670_s23 = smov 16  }
  0x10   :  { %24 = dma.hbm_to_vmem [thread:$0]  %s3890_s2, 8192, %s19_s13, [#allocation3], %s2669_s22, %s2669_s22, %s2670_s23  }
  0x11   :  { %2666 = dma.done.wait [#allocation3], 8192  }
  0x12   :  { %2667 = vsyncadd [#allocation3], 4294959104  ;;  %vm64_vm0 = vcmask 261120   ;;  %v60_v0 = vld [vmem:[%s3889_s1] sm:$0xff]  ;;  %v61_v1 = vld [vmem:[%s3889_s1 + $0x8] sm:$0xff]  ;;  %vm546_vm1 = vcmask 130048  }
  0x13   :  { %v62_v2 = vld [vmem:[%s3889_s1 + $0x10] sm:$0xff]  ;;  %v2150_v3 = vpack.c.bf16 %v61_v1, %v60_v0  ;;  %v63_v4 = vld [vmem:[%s3889_s1 + $0x18] sm:$0xff]  ;;  %v28_v5 = vld [vmem:[%s3888_s0] sm:$0xff]  ;;  %s2673_s1 = smov 96  }
  0x14   :  { %v2154_v6 = vpack.c.bf16 %v63_v4, %v62_v2  ;;  %2102 = vmatprep.mubr.msk.f32.mxu0 %vm64_vm0, %v28_v5  ;;  %v29_v7 = vld [vmem:[%s3888_s0 + $0x8] sm:$0xff]  ;;  %v30_v8 = vld [vmem:[%s3888_s0 + $0x10] sm:$0xff]  ;;  %v31_v9 = vld [vmem:[%s3888_s0 + $0x18] sm:$0xff] }
  0x15   :  { %2151 = vmatprep.subr.bf16.mxu0 %v2150_v3  ;;  %v32_v10 = vld [vmem:[%s3888_s0 + $0x20] sm:$0xff]  ;;  %v33_v11 = vld [vmem:[%s3888_s0 + $0x28] sm:$0xff]  ;;  %v34_v12 = vld [vmem:[%s3888_s0 + $0x30] sm:$0xff] }
  0x16   :  { %2153 = vmatpush3.bf16.msra.mxu0 %v2150_v3  ;;  %v35_v13 = vld [vmem:[%s3888_s0 + $0x38] sm:$0xff]  ;;  %v36_v14 = vld [vmem:[%s3888_s0 + $0x40] sm:$0xff]  ;;  %v37_v15 = vld [vmem:[%s3888_s0 + $0x48] sm:$0xff] }
  0x17   :  { %2155 = vmatprep.subr.bf16.mxu0 %v2154_v6  ;;  %v38_v16 = vld [vmem:[%s3888_s0 + $0x50] sm:$0xff]  ;;  %v39_v17 = vld [vmem:[%s3888_s0 + $0x58] sm:$0xff]  ;;  %v40_v18 = vld [vmem:[%s3888_s0 + $0x60] sm:$0xff] }
  0x18   :  { %v41_v19 = vld [vmem:[%s3888_s0 + $0x68] sm:$0xff]  ;;  %v42_v20 = vld [vmem:[%s3888_s0 + $0x70] sm:$0xff]  ;;  %v43_v21 = vld [vmem:[%s3888_s0 + $0x78] sm:$0xff] }
  0x19   :  { %v44_v22 = vld [vmem:[%s3888_s0 + $0x80] sm:$0xff]  ;;  %v45_v23 = vld [vmem:[%s3888_s0 + $0x88] sm:$0xff]  ;;  %v46_v24 = vld [vmem:[%s3888_s0 + $0x90] sm:$0xff] }
  0x1a   :  { %2157 = vmatpush3.bf16.msra.mxu0 %v2154_v6  ;;  %v47_v25 = vld [vmem:[%s3888_s0 + $0x98] sm:$0xff]  ;;  %v48_v26 = vld [vmem:[%s3888_s0 + $0xa0] sm:$0xff]  ;;  %v49_v27 = vld [vmem:[%s3888_s0 + $0xa8] sm:$0xff] }
  0x1b   :  { %v50_v28 = vld [vmem:[%s3888_s0 + $0xb0] sm:$0xff]  ;;  %v51_v29 = vld [vmem:[%s3888_s0 + $0xb8] sm:$0xff]  ;;  %v52_v30 = vld [vmem:[%s3888_s0 + $0xc0] sm:$0xff] }
  0x1c   :  { %v53_v31 = vld [vmem:[%s3888_s0 + $0xc8] sm:$0xff]  ;;  %v54_v32 = vld [vmem:[%s3888_s0 + $0xd0] sm:$0xff]  ;;  %v55_v33 = vld [vmem:[%s3888_s0 + $0xd8] sm:$0xff] }
  0x1d   :  { %2103 = vmatmul.mubr.msk.f32.vlgmr.msra.gmra.mrb[0].mxu0 %vm64_vm0, %v29_v7  ;;  %v56_v34 = vld [vmem:[%s3888_s0 + $0xe0] sm:$0xff]  ;;  %v57_v35 = vld [vmem:[%s3888_s0 + $0xe8] sm:$0xff]  ;;  %v58_v36 = vld [vmem:[%s3888_s0 + $0xf0] sm:$0xff] }
  0x1e   :  { %2105 = vmatprep.mubr.msk.f32.mxu0 %vm64_vm0, %v30_v8  ;;  %v59_v37 = vld [vmem:[%s3888_s0 + $0xf8] sm:$0xff]  ;;  %s2671_s0 = smov 112   ;;  %vm2991_vm2 = vmpackc.low %vm546_vm1, %vm546_vm1 }
  0x21   :  { %2106 = vmatmul.mubr.msk.f32.gmra.mrb[2].mxu0 %vm64_vm0, %v31_v9 }
  0x22   :  { %2108 = vmatprep.mubr.msk.f32.mxu0 %vm64_vm0, %v32_v10 }
  0x25   :  { %2109 = vmatmul.mubr.msk.f32.gmra.mrb[4].mxu0 %vm64_vm0, %v33_v11 }
  0x26   :  { %2111 = vmatprep.mubr.msk.f32.mxu0 %vm64_vm0, %v34_v12 }
  0x29   :  { %2112 = vmatmul.mubr.msk.f32.gmra.mrb[6].mxu0 %vm64_vm0, %v35_v13 }
  0x2a   :  { %2114 = vmatprep.mubr.msk.f32.mxu0 %vm64_vm0, %v36_v14 }
  0x2d   :  { %2115 = vmatmul.mubr.msk.f32.gmra.mrb[8].mxu0 %vm64_vm0, %v37_v15 }
  0x2e   :  { %2117 = vmatprep.mubr.msk.f32.mxu0 %vm64_vm0, %v38_v16 }
  0x31   :  { %2118 = vmatmul.mubr.msk.f32.gmra.mrb[10].mxu0 %vm64_vm0, %v39_v17 }
  0x32   :  { %2120 = vmatprep.mubr.msk.f32.mxu0 %vm64_vm0, %v40_v18 }
  0x35   :  { %2121 = vmatmul.mubr.msk.f32.gmra.mrb[12].mxu0 %vm64_vm0, %v41_v19  ;;  %v3892_v19 = vmov 0.0|0.0  }
  0x36   :  { %2123 = vmatprep.mubr.msk.f32.mxu0 %vm64_vm0, %v42_v20  ;;  %2206 = vmatprep.subr.bf16.mxu0 %v3892_v19 }
  0x39   :  { %2124 = vmatmul.mubr.msk.f32.gmra.mrb[14].mxu0 %vm64_vm0, %v43_v21 }
  0x3a   :  { %2126 = vmatprep.mubr.msk.f32.mxu0 %vm64_vm0, %v44_v22 }
  0x3d   :  { %2127 = vmatmul.mubr.msk.f32.gmra.mrb[16].mxu0 %vm64_vm0, %v45_v23 }
  0x3e   :  { %2129 = vmatprep.mubr.msk.f32.mxu0 %vm64_vm0, %v46_v24 }
  0x41   :  { %2130 = vmatmul.mubr.msk.f32.gmra.mrb[18].mxu0 %vm64_vm0, %v47_v25 }
  0x42   :  { %2132 = vmatprep.mubr.msk.f32.mxu0 %vm64_vm0, %v48_v26 }
  0x45   :  { %2133 = vmatmul.mubr.msk.f32.gmra.mrb[20].mxu0 %vm64_vm0, %v49_v27 }
  0x46   :  { %2135 = vmatprep.mubr.msk.f32.mxu0 %vm64_vm0, %v50_v28 }
  0x49   :  { %2136 = vmatmul.mubr.msk.f32.gmra.mrb[22].mxu0 %vm64_vm0, %v51_v29 }
  0x4a   :  { %2138 = vmatprep.mubr.msk.f32.mxu0 %vm64_vm0, %v52_v30 }
  0x4d   :  { %2139 = vmatmul.mubr.msk.f32.gmra.mrb[24].mxu0 %vm64_vm0, %v53_v31 }
  0x4e   :  { %2141 = vmatprep.mubr.msk.f32.mxu0 %vm64_vm0, %v54_v32 }
  0x51   :  { %2142 = vmatmul.mubr.msk.f32.gmra.mrb[26].mxu0 %vm64_vm0, %v55_v33 }
  0x52   :  { %2144 = vmatprep.mubr.msk.f32.mxu0 %vm64_vm0, %v56_v34 }
  0x55   :  { %2145 = vmatmul.mubr.msk.f32.gmra.mrb[28].mxu0 %vm64_vm0, %v57_v35 }
  0x56   :  { %2147 = vmatprep.mubr.msk.f32.mxu0 %vm64_vm0, %v58_v36 }
  0x59   :  { %2148 = vmatmul.mubr.msk.f32.gmra.mrb[30].mxu0 %vm64_vm0, %v59_v37 }
  0xf0   :  { %v2846_v38 = vpop.f32.mrb[0].mxu0 }
  0xf1   :  { %v2848_v39 = vpop.f32.mrb[1].mxu0 }
  0xf2   :  { %2030 = vmatprep.mubr.msk.f32.mxu1 %vm546_vm1, %v2848_v39  ;;  %v2854_v40 = vpack.i.bf16 %v2846_v38, %v2848_v39 }
  0xf4   :  { %v2856_v41 = vpop.f32.mrb[2].mxu0 }
  0xf5   :  { %v2858_v42 = vpop.f32.mrb[3].mxu0 }
  0xf6   :  { %v2862_v43 = vpack.i.bf16 %v2856_v41, %v2858_v42 }
  0xf8   :  { %v2864_v44 = vpop.f32.mrb[4].mxu0 }
  0xf9   :  { %v2866_v45 = vpop.f32.mrb[5].mxu0 }
  0xfa   :  { %v2317_v46 = vpack.i.bf16 %v2864_v44, %v2866_v45 }
  0xfc   :  { %v2870_v47 = vpop.f32.mrb[6].mxu0 }
  0xfd   :  { %v2872_v48 = vpop.f32.mrb[7].mxu0 }
  0xfe   :  { %v2327_v49 = vpack.i.bf16 %v2870_v47, %v2872_v48 }
 0x100   :  { %v2876_v50 = vpop.f32.mrb[8].mxu0 }
 0x101   :  { %v2878_v51 = vpop.f32.mrb[9].mxu0 }
 0x102   :  { %v2337_v52 = vpack.i.bf16 %v2876_v50, %v2878_v51 }
 0x104   :  { %v2882_v53 = vpop.f32.mrb[10].mxu0 }
 0x105   :  { %v2884_v54 = vpop.f32.mrb[11].mxu0 }
 0x106   :  { %v2347_v55 = vpack.i.bf16 %v2882_v53, %v2884_v54 }
 0x108   :  { %v2888_v56 = vpop.f32.mrb[12].mxu0 }
 0x109   :  { %v2890_v57 = vpop.f32.mrb[13].mxu0 }
 0x10a   :  { %v2357_v58 = vpack.i.bf16 %v2888_v56, %v2890_v57 }
 0x10c   :  { %v2894_v59 = vpop.f32.mrb[14].mxu0 }
 0x10d   :  { %v2896_v60 = vpop.f32.mrb[15].mxu0 }
 0x10e   :  { %v2367_v61 = vpack.i.bf16 %v2894_v59, %v2896_v60 }
 0x110   :  { %v2900_v62 = vpop.f32.mrb[16].mxu0 }
 0x111   :  { %v2902_v63 = vpop.f32.mrb[17].mxu0 }
 0x112   :  { %v2292_v0 = vpack.i.bf16 %v2900_v62, %v2902_v63 }
 0x114   :  { %2293 = vrot.lane.b32.xlu0 %v2292_v0, %s2671_s0  ;;  %v2907_v1 = vpop.f32.mrb[18].mxu0 }
 0x115   :  { %v2909_v2 = vpop.f32.mrb[19].mxu0 }
 0x116   :  { %v2302_v3 = vpack.i.bf16 %v2907_v1, %v2909_v2 }
 0x118   :  { %2298 = vrot.lane.b32.xlu0 %v2854_v40, %s2671_s0  ;;  %2303 = vrot.lane.b32.xlu1 %v2302_v3, %s2671_s0  ;;  %v2916_v4 = vpop.f32.mrb[20].mxu0 }
 0x119   :  { %v2918_v5 = vpop.f32.mrb[21].mxu0 }
 0x11a   :  { %v2312_v6 = vpack.i.bf16 %v2916_v4, %v2918_v5 }
 0x11c   :  { %2308 = vrot.lane.b32.xlu1 %v2862_v43, %s2671_s0  ;;  %2313 = vrot.lane.b32.xlu0 %v2312_v6, %s2671_s0  ;;  %v2925_v7 = vpop.f32.mrb[22].mxu0 }
 0x11d   :  { %v2927_v8 = vpop.f32.mrb[23].mxu0 }
 0x11e   :  { %v2322_v9 = vpack.i.bf16 %v2925_v7, %v2927_v8 }
 0x120   :  { %2318 = vrot.lane.b32.xlu1 %v2317_v46, %s2671_s0  ;;  %2323 = vrot.lane.b32.xlu0 %v2322_v9, %s2671_s0  ;;  %v2933_v10 = vpop.f32.mrb[24].mxu0 }
 0x121   :  { %v2935_v11 = vpop.f32.mrb[25].mxu0 }
 0x122   :  { %v2332_v12 = vpack.i.bf16 %v2933_v10, %v2935_v11 }
 0x124   :  { %2328 = vrot.lane.b32.xlu1 %v2327_v49, %s2671_s0  ;;  %2333 = vrot.lane.b32.xlu0 %v2332_v12, %s2671_s0  ;;  %v2941_v13 = vpop.f32.mrb[26].mxu0 }
 0x125   :  { %v2943_v14 = vpop.f32.mrb[27].mxu0 }
 0x126   :  { %v2342_v15 = vpack.i.bf16 %v2941_v13, %v2943_v14 }
 0x128   :  { %2338 = vrot.lane.b32.xlu1 %v2337_v52, %s2671_s0  ;;  %2343 = vrot.lane.b32.xlu0 %v2342_v15, %s2671_s0  ;;  %v2949_v16 = vpop.f32.mrb[28].mxu0 }
 0x129   :  { %v2951_v17 = vpop.f32.mrb[29].mxu0 }
 0x12a   :  { %v2955_v18 = vpack.i.bf16 %v2949_v16, %v2951_v17 }
 0x12c   :  { %2348 = vrot.lane.b32.xlu1 %v2347_v55, %s2671_s0  ;;  %2353 = vrot.lane.b32.xlu0 %v2955_v18, %s2671_s0  ;;  %v2961_v20 = vpop.f32.mrb[30].mxu0 }
 0x12d   :  { %v2963_v21 = vpop.f32.mrb[31].mxu0 }
 0x12e   :  { %v2967_v22 = vpack.i.bf16 %v2961_v20, %v2963_v21 }
 0x130   :  { %2358 = vrot.lane.b32.xlu1 %v2357_v58, %s2671_s0  ;;  %2363 = vrot.lane.b32.xlu0 %v2967_v22, %s2671_s0 }
 0x134   :  { %2368 = vrot.lane.b32.xlu1 %v2367_v61, %s2671_s0  ;;  %2373 = vrot.lane.b32.xlu0 %v2854_v40, %s2673_s1 }
 0x138   :  { %2378 = vrot.lane.b32.xlu1 %v2862_v43, %s2673_s1  ;;  %2388 = vrot.lane.b32.xlu0 %v2327_v49, %s2673_s1 }
 0x13c   :  { %2383 = vrot.lane.b32.xlu1 %v2317_v46, %s2673_s1  ;;  %2403 = vrot.lane.b32.xlu0 %v2357_v58, %s2673_s1 }
 0x140   :  { %2393 = vrot.lane.b32.xlu1 %v2337_v52, %s2673_s1  ;;  %2413 = vrot.lane.b32.xlu0 %v2292_v0, %s2673_s1 }
 0x144   :  { %2398 = vrot.lane.b32.xlu1 %v2347_v55, %s2673_s1  ;;  %2423 = vrot.lane.b32.xlu0 %v2312_v6, %s2673_s1 }
 0x148   :  { %2408 = vrot.lane.b32.xlu1 %v2367_v61, %s2673_s1  ;;  %2433 = vrot.lane.b32.xlu0 %v2332_v12, %s2673_s1 }
 0x14c   :  { %2418 = vrot.lane.b32.xlu1 %v2302_v3, %s2673_s1 }
 0x150   :  { %2428 = vrot.lane.b32.xlu1 %v2322_v9, %s2673_s1 }
 0x154   :  { %2438 = vrot.lane.b32.xlu1 %v2342_v15, %s2673_s1 }
 0x186   :  { %v2294_v23 = vpop.permute.xlu0 %2293 }
 0x187   :  { %v2296_v24 = vunpack.i.h.bf16 %v2294_v23  ;;  %v2295_v25 = vunpack.i.l.bf16 %v2294_v23 }
 0x189   :  { %v2158_v27 = vpack.c.bf16 %v2296_v24, %v2295_v25 }
 0x18a   :  { %v2299_v28 = vpop.permute.xlu0 %2298  ;;  %v2304_v29 = vpop.permute.xlu1 %2303 }
 0x18b   :  { %v2301_v30 = vunpack.i.h.bf16 %v2299_v28  ;;  %v2300_v31 = vunpack.i.l.bf16 %v2299_v28  ;;  %v2306_v32 = vunpack.i.h.bf16 %v2304_v29  ;;  %v2305_v33 = vunpack.i.l.bf16 %v2304_v29  ;;  %2160 = vmatprep.subr.msk.bf16.mxu1 %vm2991_vm2, %v2158_v27 }
 0x18d   :  { %v2161_v34 = vpack.c.bf16 %v2301_v30, %v2300_v31  ;;  %v2164_v35 = vpack.c.bf16 %v2306_v32, %v2305_v33 }
 0x18e   :  { %v2309_v36 = vpop.permute.xlu1 %2308  ;;  %v2314_v37 = vpop.permute.xlu0 %2313 }
 0x18f   :  { %2163 = vmatpush3.bf16.xpose.msk.msra.mxu1 %vm2991_vm2, %v2161_v34  ;;  %v2316_v40 = vunpack.i.h.bf16 %v2314_v37  ;;  %v2315_v43 = vunpack.i.l.bf16 %v2314_v37  ;;  %v2311_v46 = vunpack.i.h.bf16 %v2309_v36  ;;  %v2310_v49 = vunpack.i.l.bf16 %v2309_v36 }
 0x190   :  { %2166 = vmatprep.subr.msk.bf16.mxu1 %vm2991_vm2, %v2164_v35 }
 0x191   :  { %v2170_v58 = vpack.c.bf16 %v2316_v40, %v2315_v43  ;;  %v2167_v61 = vpack.c.bf16 %v2311_v46, %v2310_v49 }
 0x192   :  { %v2319_v52 = vpop.permute.xlu1 %2318  ;;  %v2324_v55 = vpop.permute.xlu0 %2323 }
 0x193   :  { %v2326_v6 = vunpack.i.h.bf16 %v2324_v55  ;;  %v2325_v9 = vunpack.i.l.bf16 %v2324_v55  ;;  %v2321_v12 = vunpack.i.h.bf16 %v2319_v52  ;;  %v2320_v15 = vunpack.i.l.bf16 %v2319_v52 }
 0x195   :  { %v2176_v25 = vpack.c.bf16 %v2326_v6, %v2325_v9  ;;  %v2173_v27 = vpack.c.bf16 %v2321_v12, %v2320_v15 }
 0x196   :  { %v2329_v0 = vpop.permute.xlu1 %2328  ;;  %v2334_v3 = vpop.permute.xlu0 %2333 }
 0x197   :  { %2169 = vmatpush3.bf16.xpose.msk.msra.mxu1 %vm2991_vm2, %v2167_v61  ;;  %v2336_v30 = vunpack.i.h.bf16 %v2334_v3  ;;  %v2335_v31 = vunpack.i.l.bf16 %v2334_v3  ;;  %v2331_v32 = vunpack.i.h.bf16 %v2329_v0  ;;  %v2330_v33 = vunpack.i.l.bf16 %v2329_v0 }
 0x198   :  { %2172 = vmatprep.subr.msk.bf16.mxu1 %vm2991_vm2, %v2170_v58 }
 0x199   :  { %v2182_v36 = vpack.c.bf16 %v2336_v30, %v2335_v31  ;;  %v2179_v37 = vpack.c.bf16 %v2331_v32, %v2330_v33 }
 0x19a   :  { %v2339_v23 = vpop.permute.xlu1 %2338  ;;  %v2344_v24 = vpop.permute.xlu0 %2343 }
 0x19b   :  { %v2346_v52 = vunpack.i.h.bf16 %v2344_v24  ;;  %v2345_v55 = vunpack.i.l.bf16 %v2344_v24  ;;  %v2341_v58 = vunpack.i.h.bf16 %v2339_v23  ;;  %v2340_v61 = vunpack.i.l.bf16 %v2339_v23 }
 0x19d   :  { %v2188_v12 = vpack.c.bf16 %v2346_v52, %v2345_v55  ;;  %v2185_v15 = vpack.c.bf16 %v2341_v58, %v2340_v61 }
 0x19e   :  { %v2349_v28 = vpop.permute.xlu1 %2348  ;;  %v2354_v29 = vpop.permute.xlu0 %2353 }
 0x19f   :  { %2175 = vmatpush3.bf16.xpose.msk.msra.mxu1 %vm2991_vm2, %v2173_v27  ;;  %v2351_v23 = vunpack.i.h.bf16 %v2349_v28  ;;  %v2356_v32 = vunpack.i.h.bf16 %v2354_v29  ;;  %v2355_v33 = vunpack.i.l.bf16 %v2354_v29 }
 0x1a0   :  { %2178 = vmatprep.subr.msk.bf16.mxu1 %vm2991_vm2, %v2176_v25 }
 0x1a1   :  { %v2194_v52 = vpack.c.bf16 %v2356_v32, %v2355_v33 }
 0x1a2   :  { %v3009_v34 = vpop.permute.xlu1 %2358  ;;  %v2364_v35 = vpop.permute.xlu0 %2363 }
 0x1a6   :  { %v3011_v40 = vpop.permute.xlu1 %2368  ;;  %v2374_v43 = vpop.permute.xlu0 %2373 }
 0x1a7   :  { %v2376_v46 = vunpack.i.h.bf16 %v2374_v43  ;;  %v2375_v49 = vunpack.i.l.bf16 %v2374_v43  ;;  %2181 = vmatpush3.bf16.xpose.msk.msra.mxu1 %vm2991_vm2, %v2179_v37 }
 0x1a8   :  { %2184 = vmatprep.subr.msk.bf16.mxu1 %vm2991_vm2, %v2182_v36  ;;  %v2350_v36 = vunpack.i.l.bf16 %v2349_v28  ;;  %v2361_v28 = vunpack.i.h.bf16 %v3009_v34 }
 0x1a9   :  { %v3017_v0 = vpack.c.bf16 %v2376_v46, %v2375_v49 }
 0x1aa   :  { %v2379_v3 = vpop.permute.xlu1 %2378  ;;  %v2389_v27 = vpop.permute.xlu0 %2388  ;;  %v2191_v55 = vpack.c.bf16 %v2351_v23, %v2350_v36 }
 0x1ab   :  { %v2381_v6 = vunpack.i.h.bf16 %v2379_v3  ;;  %v2380_v9 = vunpack.i.l.bf16 %v2379_v3  ;;  %2208 = vmatpush1.bf16.msra.mxu0 %v3017_v0  ;;  %v2391_v37 = vunpack.i.h.bf16 %v2389_v27  ;;  %v2390_v43 = vunpack.i.l.bf16 %v2389_v27 }
 0x1ac   :  { %2209 = vmatprep.subr.bf16.mxu0 %v3892_v19 }
 0x1ad   :  { %v3021_v25 = vpack.c.bf16 %v2381_v6, %v2380_v9  ;;  %v3033_v58 = vpack.c.bf16 %v2391_v37, %v2390_v43  ;;  %v2366_v6 = vunpack.i.h.bf16 %v2364_v35  ;;  %v2365_v9 = vunpack.i.l.bf16 %v2364_v35 }
 0x1ae   :  { %v2384_v24 = vpop.permute.xlu1 %2383  ;;  %v2370_v37 = vunpack.i.l.bf16 %v3011_v40 }
 0x1af   :  { %v2386_v30 = vunpack.i.h.bf16 %v2384_v24  ;;  %v2385_v31 = vunpack.i.l.bf16 %v2384_v24  ;;  %2187 = vmatpush3.bf16.xpose.msk.msra.mxu1 %vm2991_vm2, %v2185_v15  ;;  %2211 = vmatpush1.bf16.msra.mxu0 %v3021_v25 }
 0x1b0   :  { %2212 = vmatprep.subr.bf16.mxu0 %v3892_v19  ;;  %2190 = vmatprep.subr.msk.bf16.mxu1 %vm2991_vm2, %v2188_v12  ;;  %v2360_v12 = vunpack.i.l.bf16 %v3009_v34  ;;  %v2371_v34 = vunpack.i.h.bf16 %v3011_v40 }
 0x1b1   :  { %v3029_v46 = vpack.c.bf16 %v2386_v30, %v2385_v31  ;;  %v2404_v30 = vpop.permute.xlu0 %2403  ;;  %v2200_v31 = vpack.c.bf16 %v2366_v6, %v2365_v9 }
 0x1b2   :  { %v2394_v49 = vpop.permute.xlu1 %2393  ;;  %v2197_v23 = vpack.c.bf16 %v2361_v28, %v2360_v12  ;;  %v2406_v32 = vunpack.i.h.bf16 %v2404_v30  ;;  %v2405_v35 = vunpack.i.l.bf16 %v2404_v30 }
 0x1b3   :  { %2214 = vmatpush1.bf16.msra.mxu0 %v3029_v46  ;;  %v2396_v29 = vunpack.i.h.bf16 %v2394_v49  ;;  %v2395_v61 = vunpack.i.l.bf16 %v2394_v49 }
 0x1b4   :  { %2215 = vmatprep.subr.bf16.mxu0 %v3892_v19  ;;  %v3057_v43 = vpack.c.bf16 %v2406_v32, %v2405_v35 }
 0x1b5   :  { %v3043_v15 = vpack.c.bf16 %v2396_v29, %v2395_v61  ;;  %v2203_v29 = vpack.c.bf16 %v2371_v34, %v2370_v37 }
 0x1b6   :  { %v2399_v3 = vpop.permute.xlu1 %2398 }
 0x1b7   :  { %2193 = vmatpush3.bf16.xpose.msk.msra.mxu1 %vm2991_vm2, %v2191_v55  ;;  %2217 = vmatpush1.bf16.msra.mxu0 %v3033_v58  ;;  %v2401_v27 = vunpack.i.h.bf16 %v2399_v3  ;;  %v2400_v24 = vunpack.i.l.bf16 %v2399_v3  ;;  %v2414_v55 = vpop.permute.xlu0 %2413 }
 0x1b8   :  { %2218 = vmatprep.subr.bf16.mxu0 %v3892_v19  ;;  %2196 = vmatprep.subr.msk.bf16.mxu1 %vm2991_vm2, %v2194_v52  ;;  %v2416_v61 = vunpack.i.h.bf16 %v2414_v55  ;;  %v2415_v3 = vunpack.i.l.bf16 %v2414_v55  ;;  %v397_v55 = vld [vmem:[#allocation2 + $0x58] sm:$0xff] }
 0x1b9   :  { %v3047_v33 = vpack.c.bf16 %v2401_v27, %v2400_v24 }
 0x1ba   :  { %v2409_v36 = vpop.permute.xlu1 %2408  ;;  %v3068_v40 = vpack.c.bf16 %v2416_v61, %v2415_v3 }
 0x1bb   :  { %2220 = vmatpush1.bf16.msra.mxu0 %v3043_v15  ;;  %v2411_v49 = vunpack.i.h.bf16 %v2409_v36  ;;  %v2410_v52 = vunpack.i.l.bf16 %v2409_v36  ;;  %v2424_v27 = vpop.permute.xlu0 %2423 }
 0x1bc   :  { %2221 = vmatprep.subr.bf16.mxu0 %v3892_v19  ;;  %v2426_v24 = vunpack.i.h.bf16 %v2424_v27  ;;  %v2425_v30 = vunpack.i.l.bf16 %v2424_v27 }
 0x1bd   :  { %v3061_v28 = vpack.c.bf16 %v2411_v49, %v2410_v52  ;;  %v396_v52 = vld [vmem:[#allocation2 + $0x50] sm:$0xff] }
 0x1be   :  { %v2419_v6 = vpop.permute.xlu1 %2418 }
 0x1bf   :  { %2199 = vmatpush3.bf16.xpose.msk.msra.mxu1 %vm2991_vm2, %v2197_v23  ;;  %2223 = vmatpush1.bf16.msra.mxu0 %v3047_v33  ;;  %v2421_v9 = vunpack.i.h.bf16 %v2419_v6  ;;  %v2420_v12 = vunpack.i.l.bf16 %v2419_v6  ;;  %v2237_v23 = vpack.c.bf16 %v2426_v24, %v2425_v30  ;;  %v2434_v36 = vpop.permute.xlu0 %2433 }
 0x1c0   :  { %2224 = vmatprep.subr.bf16.mxu0 %v3892_v19  ;;  %2202 = vmatprep.subr.msk.bf16.mxu1 %vm2991_vm2, %v2200_v31 }
 0x1c1   :  { %v2234_v31 = vpack.c.bf16 %v2421_v9, %v2420_v12  ;;  %v399_v9 = vld [vmem:[#allocation2 + $0x68] sm:$0xff] }
 0x1c2   :  { %v2429_v26 = vpop.permute.xlu1 %2428 }
 0x1c3   :  { %2226 = vmatpush1.bf16.msra.mxu0 %v3057_v43  ;;  %v2431_v32 = vunpack.i.h.bf16 %v2429_v26  ;;  %v2430_v35 = vunpack.i.l.bf16 %v2429_v26  ;;  %v400_v26 = vld [vmem:[#allocation2 + $0x70] sm:$0xff] }
 0x1c4   :  { %2227 = vmatprep.subr.bf16.mxu0 %v3892_v19 }
 0x1c5   :  { %v2240_v34 = vpack.c.bf16 %v2431_v32, %v2430_v35 }
 0x1c6   :  { %v2439_v37 = vpop.permute.xlu1 %2438 }
 0x1c7   :  { %2205 = vmatpush3.bf16.xpose.msk.msra.mxu1 %vm2991_vm2, %v2203_v29  ;;  %2229 = vmatpush1.bf16.msra.mxu0 %v3061_v28  ;;  %v2440_v49 = vunpack.i.l.bf16 %v2439_v37 }
 0x1c8   :  { %2230 = vmatprep.subr.bf16.mxu0 %v3892_v19  ;;  %2254 = vmatprep.subr.bf16.mxu1 %v3892_v19 }
 0x1cb   :  { %2232 = vmatpush1.bf16.msra.mxu0 %v3068_v40 }
 0x1cc   :  { %2233 = vmatprep.subr.bf16.mxu0 %v3892_v19 }
 0x1ce   :  { %2031 = vmatmul.mubr.msk.f32.vlgmr.msra.gmra.mrb[0].mxu1 %vm546_vm1, %v2848_v39  ;;  %v2436_v39 = vunpack.i.h.bf16 %v2434_v36 }
 0x1cf   :  { %2032 = vmatprep.mubr.msk.f32.mxu1 %vm546_vm1, %v2846_v38  ;;  %2270 = vmatpush1.bf16.msra.mxu1 %v3017_v0  ;;  %v2435_v0 = vunpack.i.l.bf16 %v2434_v36 }
 0x1d0   :  { %2235 = vmatpush1.bf16.msra.mxu0 %v2234_v31  ;;  %2255 = vmatprep.subr.bf16.mxu1 %v3892_v19 }
 0x1d1   :  { %2236 = vmatprep.subr.bf16.mxu0 %v3892_v19 }
 0x1d2   :  { %2033 = vmatmul.mubr.msk.f32.gmra.mrb[2].mxu1 %vm546_vm1, %v2846_v38  ;;  %v2243_v38 = vpack.c.bf16 %v2436_v39, %v2435_v0 }
 0x1d3   :  { %2034 = vmatprep.mubr.msk.f32.mxu1 %vm546_vm1, %v2858_v42  ;;  %2271 = vmatpush1.bf16.msra.mxu1 %v3021_v25  ;;  %v2441_v25 = vunpack.i.h.bf16 %v2439_v37  ;;  %v403_v37 = vld [vmem:[#allocation2 + $0x88] sm:$0xff] }
 0x1d4   :  { %2238 = vmatpush1.bf16.msra.mxu0 %v2237_v23  ;;  %2256 = vmatprep.subr.bf16.mxu1 %v3892_v19 }
 0x1d5   :  { %2239 = vmatprep.subr.bf16.mxu0 %v3892_v19 }
 0x1d6   :  { %2035 = vmatmul.mubr.msk.f32.gmra.mrb[4].mxu1 %vm546_vm1, %v2858_v42  ;;  %v2246_v42 = vpack.c.bf16 %v2441_v25, %v2440_v49 }
 0x1d7   :  { %2036 = vmatprep.mubr.msk.f32.mxu1 %vm546_vm1, %v2856_v41  ;;  %2272 = vmatpush1.bf16.msra.mxu1 %v3029_v46 }
 0x1d8   :  { %2241 = vmatpush1.bf16.msra.mxu0 %v2240_v34  ;;  %2257 = vmatprep.subr.bf16.mxu1 %v3892_v19 }
 0x1d9   :  { %2242 = vmatprep.subr.bf16.mxu0 %v3892_v19 }
 0x1da   :  { %2037 = vmatmul.mubr.msk.f32.gmra.mrb[6].mxu1 %vm546_vm1, %v2856_v41  ;;  %v386_v41 = vld [vmem:[#allocation2] sm:$0xff] }
 0x1db   :  { %2038 = vmatprep.mubr.msk.f32.mxu1 %vm546_vm1, %v2866_v45  ;;  %2273 = vmatpush1.bf16.msra.mxu1 %v3033_v58 }
 0x1dc   :  { %2244 = vmatpush1.bf16.msra.mxu0 %v2243_v38  ;;  %2258 = vmatprep.subr.bf16.mxu1 %v3892_v19 }
 0x1dd   :  { %2245 = vmatprep.subr.bf16.mxu0 %v3892_v19 }
 0x1de   :  { %2039 = vmatmul.mubr.msk.f32.gmra.mrb[8].mxu1 %vm546_vm1, %v2866_v45 }
 0x1df   :  { %2040 = vmatprep.mubr.msk.f32.mxu1 %vm546_vm1, %v2864_v44  ;;  %2274 = vmatpush1.bf16.msra.mxu1 %v3043_v15 }
 0x1e0   :  { %2247 = vmatpush1.bf16.msra.mxu0 %v2246_v42  ;;  %2259 = vmatprep.subr.bf16.mxu1 %v3892_v19 }
 0x1e1   :  { %2248 = vmatprep.subr.bf16.mxu0 %v3892_v19 }
 0x1e2   :  { %2041 = vmatmul.mubr.msk.f32.gmra.mrb[10].mxu1 %vm546_vm1, %v2864_v44  ;;  %v387_v44 = vld [vmem:[#allocation2 + $0x8] sm:$0xff] }
 0x1e3   :  { %2042 = vmatprep.mubr.msk.f32.mxu1 %vm546_vm1, %v2872_v48  ;;  %2275 = vmatpush1.bf16.msra.mxu1 %v3047_v33 }
 0x1e4   :  { %2260 = vmatprep.subr.bf16.mxu1 %v3892_v19 }
 0x1e6   :  { %2043 = vmatmul.mubr.msk.f32.gmra.mrb[12].mxu1 %vm546_vm1, %v2872_v48 }
 0x1e7   :  { %2044 = vmatprep.mubr.msk.f32.mxu1 %vm546_vm1, %v2870_v47  ;;  %2276 = vmatpush1.bf16.msra.mxu1 %v3057_v43 }
 0x1e8   :  { %2261 = vmatprep.subr.bf16.mxu1 %v3892_v19 }
 0x1ea   :  { %2045 = vmatmul.mubr.msk.f32.gmra.mrb[14].mxu1 %vm546_vm1, %v2870_v47 }
 0x1eb   :  { %2046 = vmatprep.mubr.msk.f32.mxu1 %vm546_vm1, %v2878_v51  ;;  %2277 = vmatpush1.bf16.msra.mxu1 %v3061_v28 }
 0x1ec   :  { %2262 = vmatprep.subr.bf16.mxu1 %v3892_v19 }
 0x1ee   :  { %2047 = vmatmul.mubr.msk.f32.gmra.mrb[16].mxu1 %vm546_vm1, %v2878_v51  ;;  %v388_v51 = vld [vmem:[#allocation2 + $0x10] sm:$0xff] }
 0x1ef   :  { %2048 = vmatprep.mubr.msk.f32.mxu1 %vm546_vm1, %v2876_v50  ;;  %2278 = vmatpush1.bf16.msra.mxu1 %v3068_v40  ;;  %v398_v40 = vld [vmem:[#allocation2 + $0x60] sm:$0xff] }
 0x1f0   :  { %2263 = vmatprep.subr.bf16.mxu1 %v3892_v19 }
 0x1f2   :  { %2049 = vmatmul.mubr.msk.f32.gmra.mrb[18].mxu1 %vm546_vm1, %v2876_v50 }
 0x1f3   :  { %2050 = vmatprep.mubr.msk.f32.mxu1 %vm546_vm1, %v2884_v54  ;;  %2279 = vmatpush1.bf16.msra.mxu1 %v2234_v31 }
 0x1f4   :  { %2264 = vmatprep.subr.bf16.mxu1 %v3892_v19 }
 0x1f6   :  { %2051 = vmatmul.mubr.msk.f32.gmra.mrb[20].mxu1 %vm546_vm1, %v2884_v54 }
 0x1f7   :  { %2052 = vmatprep.mubr.msk.f32.mxu1 %vm546_vm1, %v2882_v53  ;;  %2280 = vmatpush1.bf16.msra.mxu1 %v2237_v23  ;;  %v401_v23 = vld [vmem:[#allocation2 + $0x78] sm:$0xff] }
 0x1f8   :  { %2265 = vmatprep.subr.bf16.mxu1 %v3892_v19 }
 0x1fa   :  { %2053 = vmatmul.mubr.msk.f32.gmra.mrb[22].mxu1 %vm546_vm1, %v2882_v53  ;;  %v389_v53 = vld [vmem:[#allocation2 + $0x18] sm:$0xff] }
 0x1fb   :  { %2054 = vmatprep.mubr.msk.f32.mxu1 %vm546_vm1, %v2890_v57  ;;  %2281 = vmatpush1.bf16.msra.mxu1 %v2240_v34  ;;  %v402_v34 = vld [vmem:[#allocation2 + $0x80] sm:$0xff] }
 0x1fc   :  { %2266 = vmatprep.subr.bf16.mxu1 %v3892_v19 }
 0x1fe   :  { %2055 = vmatmul.mubr.msk.f32.gmra.mrb[24].mxu1 %vm546_vm1, %v2890_v57 }
 0x1ff   :  { %2056 = vmatprep.mubr.msk.f32.mxu1 %vm546_vm1, %v2888_v56  ;;  %2282 = vmatpush1.bf16.msra.mxu1 %v2243_v38 }
 0x200   :  { %2267 = vmatprep.subr.bf16.mxu1 %v3892_v19 }
 0x202   :  { %2057 = vmatmul.mubr.msk.f32.gmra.mrb[26].mxu1 %vm546_vm1, %v2888_v56 }
 0x203   :  { %2058 = vmatprep.mubr.msk.f32.mxu1 %vm546_vm1, %v2896_v60  ;;  %2283 = vmatpush1.bf16.msra.mxu1 %v2246_v42 }
 0x204   :  { %2268 = vmatprep.subr.bf16.mxu1 %v3892_v19 }
 0x206   :  { %2059 = vmatmul.mubr.msk.f32.gmra.mrb[28].mxu1 %vm546_vm1, %v2896_v60 }
 0x207   :  { %2060 = vmatprep.mubr.msk.f32.mxu1 %vm546_vm1, %v2894_v59 }
 0x20a   :  { %2061 = vmatmul.mubr.msk.f32.gmra.mrb[30].mxu1 %vm546_vm1, %v2894_v59 }
 0x20b   :  { %2062 = vmatprep.mubr.msk.f32.mxu1 %vm546_vm1, %v2902_v63 }
 0x20e   :  { %2063 = vmatmul.mubr.msk.f32.gmra.mrb[32].mxu1 %vm546_vm1, %v2902_v63  ;;  %v391_v63 = vld [vmem:[#allocation2 + $0x28] sm:$0xff] }
 0x20f   :  { %2064 = vmatprep.mubr.msk.f32.mxu1 %vm546_vm1, %v2900_v62 }
 0x212   :  { %2065 = vmatmul.mubr.msk.f32.gmra.mrb[34].mxu1 %vm546_vm1, %v2900_v62  ;;  %v390_v62 = vld [vmem:[#allocation2 + $0x20] sm:$0xff] }
 0x213   :  { %2066 = vmatprep.mubr.msk.f32.mxu1 %vm546_vm1, %v2909_v2 }
 0x216   :  { %2067 = vmatmul.mubr.msk.f32.gmra.mrb[36].mxu1 %vm546_vm1, %v2909_v2 }
 0x217   :  { %2068 = vmatprep.mubr.msk.f32.mxu1 %vm546_vm1, %v2907_v1 }
 0x21a   :  { %2069 = vmatmul.mubr.msk.f32.gmra.mrb[38].mxu1 %vm546_vm1, %v2907_v1 }
 0x21b   :  { %2070 = vmatprep.mubr.msk.f32.mxu1 %vm546_vm1, %v2918_v5 }
 0x21e   :  { %2071 = vmatmul.mubr.msk.f32.gmra.mrb[40].mxu1 %vm546_vm1, %v2918_v5 }
 0x21f   :  { %2072 = vmatprep.mubr.msk.f32.mxu1 %vm546_vm1, %v2916_v4 }
 0x222   :  { %2073 = vmatmul.mubr.msk.f32.gmra.mrb[42].mxu1 %vm546_vm1, %v2916_v4 }
 0x223   :  { %2074 = vmatprep.mubr.msk.f32.mxu1 %vm546_vm1, %v2927_v8 }
 0x226   :  { %2075 = vmatmul.mubr.msk.f32.gmra.mrb[44].mxu1 %vm546_vm1, %v2927_v8  ;;  %v392_v8 = vld [vmem:[#allocation2 + $0x30] sm:$0xff] }
 0x227   :  { %2076 = vmatprep.mubr.msk.f32.mxu1 %vm546_vm1, %v2925_v7 }
 0x22a   :  { %2077 = vmatmul.mubr.msk.f32.gmra.mrb[46].mxu1 %vm546_vm1, %v2925_v7 }
 0x22b   :  { %2078 = vmatprep.mubr.msk.f32.mxu1 %vm546_vm1, %v2935_v11 }
 0x22e   :  { %2079 = vmatmul.mubr.msk.f32.gmra.mrb[48].mxu1 %vm546_vm1, %v2935_v11 }
 0x22f   :  { %2080 = vmatprep.mubr.msk.f32.mxu1 %vm546_vm1, %v2933_v10 }
 0x232   :  { %2081 = vmatmul.mubr.msk.f32.gmra.mrb[50].mxu1 %vm546_vm1, %v2933_v10  ;;  %v393_v10 = vld [vmem:[#allocation2 + $0x38] sm:$0xff] }
 0x233   :  { %2082 = vmatprep.mubr.msk.f32.mxu1 %vm546_vm1, %v2943_v14 }
 0x236   :  { %2083 = vmatmul.mubr.msk.f32.gmra.mrb[52].mxu1 %vm546_vm1, %v2943_v14 }
 0x237   :  { %2084 = vmatprep.mubr.msk.f32.mxu1 %vm546_vm1, %v2941_v13 }
 0x23a   :  { %2085 = vmatmul.mubr.msk.f32.gmra.mrb[54].mxu1 %vm546_vm1, %v2941_v13 }
 0x23b   :  { %2086 = vmatprep.mubr.msk.f32.mxu1 %vm546_vm1, %v2951_v17 }
 0x23e   :  { %2087 = vmatmul.mubr.msk.f32.gmra.mrb[56].mxu1 %vm546_vm1, %v2951_v17 }
 0x23f   :  { %2088 = vmatprep.mubr.msk.f32.mxu1 %vm546_vm1, %v2949_v16 }
 0x242   :  { %2089 = vmatmul.mubr.msk.f32.gmra.mrb[58].mxu1 %vm546_vm1, %v2949_v16 }
 0x243   :  { %2090 = vmatprep.mubr.msk.f32.mxu1 %vm546_vm1, %v2963_v21 }
 0x246   :  { %2091 = vmatmul.mubr.msk.f32.gmra.mrb[60].mxu1 %vm546_vm1, %v2963_v21  ;;  %v395_v21 = vld [vmem:[#allocation2 + $0x48] sm:$0xff] }
 0x247   :  { %2092 = vmatprep.mubr.msk.f32.mxu1 %vm546_vm1, %v2961_v20 }
 0x24a   :  { %2093 = vmatmul.mubr.msk.f32.gmra.mrb[62].mxu1 %vm546_vm1, %v2961_v20  ;;  %v394_v20 = vld [vmem:[#allocation2 + $0x40] sm:$0xff] }
 0x2a1   :  { %v741_v45 = vpop.f32.mrb[0].mxu1 }
 0x2a2   :  { %v3226_v47 = vadd.f32 %v741_v45, %v386_v41  ;;  %v743_v48 = vpop.f32.mrb[1].mxu1  ;;  %v405_v45 = vld [vmem:[#allocation2 + $0x98] sm:$0xff] }
 0x2a3   :  { %v3228_v50 = vadd.f32 %v743_v48, %v387_v44  ;;  %v404_v44 = vld [vmem:[#allocation2 + $0x90] sm:$0xff] }
 0x2a5   :  { %v747_v54 = vpop.f32.mrb[2].mxu1  ;;  %v932_v56 = vmax.f32 %v3226_v47, %v3228_v50 }
 0x2a6   :  { %v3232_v57 = vadd.f32 %v747_v54, %v388_v51  ;;  %v749_v59 = vpop.f32.mrb[3].mxu1 }
 0x2a7   :  { %v3234_v60 = vadd.f32 %v749_v59, %v389_v53  ;;  %933 = vmax.xlane.f32.xlu0 %v932_v56  ;;  %v406_v59 = vld [vmem:[#allocation2 + $0xa0] sm:$0xff] }
 0x2a9   :  { %v753_v1 = vpop.f32.mrb[4].mxu1  ;;  %v935_v2 = vmax.f32 %v3232_v57, %v3234_v60 }
 0x2aa   :  { %v3238_v4 = vadd.f32 %v753_v1, %v390_v62  ;;  %v755_v5 = vpop.f32.mrb[5].mxu1  ;;  %v407_v62 = vld [vmem:[#allocation2 + $0xa8] sm:$0xff] }
 0x2ab   :  { %v3240_v7 = vadd.f32 %v755_v5, %v391_v63  ;;  %936 = vmax.xlane.f32.xlu1 %v935_v2 }
 0x2ad   :  { %v759_v11 = vpop.f32.mrb[6].mxu1  ;;  %v938_v13 = vmax.f32 %v3238_v4, %v3240_v7 }
 0x2ae   :  { %v3244_v14 = vadd.f32 %v759_v11, %v392_v8  ;;  %v761_v16 = vpop.f32.mrb[7].mxu1  ;;  %v409_v11 = vld [vmem:[#allocation2 + $0xb8] sm:$0xff] }
 0x2af   :  { %v3246_v17 = vadd.f32 %v761_v16, %v393_v10  ;;  %939 = vmax.xlane.f32.xlu0 %v938_v13  ;;  %v408_v10 = vld [vmem:[#allocation2 + $0xb0] sm:$0xff] }
 0x2b1   :  { %v765_v46 = vpop.f32.mrb[8].mxu1  ;;  %v941_v58 = vmax.f32 %v3244_v14, %v3246_v17 }
 0x2b2   :  { %v3250_v15 = vadd.f32 %v765_v46, %v394_v20  ;;  %v767_v33 = vpop.f32.mrb[9].mxu1 }
 0x2b3   :  { %v3252_v43 = vadd.f32 %v767_v33, %v395_v21  ;;  %942 = vmax.xlane.f32.xlu0 %v941_v58  ;;  %v410_v58 = vld [vmem:[#allocation2 + $0xc0] sm:$0xff]  ;;  %v411_v33 = vld [vmem:[#allocation2 + $0xc8] sm:$0xff] }
 0x2b5   :  { %v771_v29 = vpop.f32.mrb[10].mxu1  ;;  %v944_v61 = vmax.f32 %v3250_v15, %v3252_v43 }
 0x2b6   :  { %v3256_v3 = vadd.f32 %v771_v29, %v396_v52  ;;  %v773_v28 = vpop.f32.mrb[11].mxu1 }
 0x2b7   :  { %v3258_v6 = vadd.f32 %v773_v28, %v397_v55  ;;  %945 = vmax.xlane.f32.xlu1 %v944_v61 }
 0x2b9   :  { %v777_v12 = vpop.f32.mrb[12].mxu1  ;;  %v947_v27 = vmax.f32 %v3256_v3, %v3258_v6 }
 0x2ba   :  { %v3262_v24 = vadd.f32 %v777_v12, %v398_v40  ;;  %v779_v30 = vpop.f32.mrb[13].mxu1  ;;  %v412_v40 = vld [vmem:[#allocation2 + $0xd0] sm:$0xff] }
 0x2bb   :  { %v3264_v31 = vadd.f32 %v779_v30, %v399_v9  ;;  %948 = vmax.xlane.f32.xlu0 %v947_v27  ;;  %v413_v9 = vld [vmem:[#allocation2 + $0xd8] sm:$0xff] }
 0x2bd   :  { %v783_v32 = vpop.f32.mrb[14].mxu1  ;;  %v950_v35 = vmax.f32 %v3262_v24, %v3264_v31 }
 0x2be   :  { %v3268_v36 = vadd.f32 %v783_v32, %v400_v26  ;;  %v785_v39 = vpop.f32.mrb[15].mxu1  ;;  %v414_v32 = vld [vmem:[#allocation2 + $0xe0] sm:$0xff] }
 0x2bf   :  { %v3270_v0 = vadd.f32 %v785_v39, %v401_v23  ;;  %951 = vmax.xlane.f32.xlu1 %v950_v35  ;;  %v415_v35 = vld [vmem:[#allocation2 + $0xe8] sm:$0xff] }
 0x2c1   :  { %v789_v38 = vpop.f32.mrb[16].mxu1  ;;  %v953_v25 = vmax.f32 %v3268_v36, %v3270_v0 }
 0x2c2   :  { %v3274_v49 = vadd.f32 %v789_v38, %v402_v34  ;;  %v791_v42 = vpop.f32.mrb[17].mxu1 }
 0x2c3   :  { %v3276_v41 = vadd.f32 %v791_v42, %v403_v37  ;;  %954 = vmax.xlane.f32.xlu0 %v953_v25  ;;  %v416_v42 = vld [vmem:[#allocation2 + $0xf0] sm:$0xff] }
 0x2c5   :  { %v795_v48 = vpop.f32.mrb[18].mxu1  ;;  %v956_v51 = vmax.f32 %v3274_v49, %v3276_v41 }
 0x2c6   :  { %v3280_v53 = vadd.f32 %v795_v48, %v404_v44  ;;  %v797_v54 = vpop.f32.mrb[19].mxu1  ;;  %v417_v44 = vld [vmem:[#allocation2 + $0xf8] sm:$0xff] }
 0x2c7   :  { %v3282_v56 = vadd.f32 %v797_v54, %v405_v45  ;;  %957 = vmax.xlane.f32.xlu1 %v956_v51 }
 0x2c9   :  { %v801_v63 = vpop.f32.mrb[20].mxu1  ;;  %v959_v1 = vmax.f32 %v3280_v53, %v3282_v56 }
 0x2ca   :  { %v3286_v2 = vadd.f32 %v801_v63, %v406_v59  ;;  %v803_v5 = vpop.f32.mrb[21].mxu1  ;;  %v419_v63 = vld [vmem:[#allocation2 + $0x108] sm:$0xff] }
 0x2cb   :  { %v3288_v8 = vadd.f32 %v803_v5, %v407_v62  ;;  %960 = vmax.xlane.f32.xlu0 %v959_v1  ;;  %v418_v62 = vld [vmem:[#allocation2 + $0x100] sm:$0xff] }
 0x2cd   :  { %v807_v13 = vpop.f32.mrb[22].mxu1  ;;  %v962_v16 = vmax.f32 %v3286_v2, %v3288_v8 }
 0x2ce   :  { %v3292_v20 = vadd.f32 %v807_v13, %v408_v10  ;;  %v809_v21 = vpop.f32.mrb[23].mxu1 }
 0x2cf   :  { %v3294_v46 = vadd.f32 %v809_v21, %v409_v11  ;;  %963 = vmax.xlane.f32.xlu1 %v962_v16  ;;  %v420_v16 = vld [vmem:[#allocation2 + $0x110] sm:$0xff]  ;;  %v421_v21 = vld [vmem:[#allocation2 + $0x118] sm:$0xff] }
 0x2d1   :  { %v813_v52 = vpop.f32.mrb[24].mxu1  ;;  %v965_v55 = vmax.f32 %v3292_v20, %v3294_v46 }
 0x2d2   :  { %v3298_v29 = vadd.f32 %v813_v52, %v410_v58  ;;  %v815_v61 = vpop.f32.mrb[25].mxu1 }
 0x2d3   :  { %v3300_v28 = vadd.f32 %v815_v61, %v411_v33  ;;  %966 = vmax.xlane.f32.xlu0 %v965_v55 }
 0x2d5   :  { %v819_v12 = vpop.f32.mrb[26].mxu1  ;;  %v968_v27 = vmax.f32 %v3298_v29, %v3300_v28 }
 0x2d6   :  { %v3304_v30 = vadd.f32 %v819_v12, %v412_v40  ;;  %v821_v26 = vpop.f32.mrb[27].mxu1  ;;  %v422_v40 = vld [vmem:[#allocation2 + $0x120] sm:$0xff] }
 0x2d7   :  { %v3306_v23 = vadd.f32 %v821_v26, %v413_v9  ;;  %969 = vmax.xlane.f32.xlu1 %v968_v27  ;;  %v423_v9 = vld [vmem:[#allocation2 + $0x128] sm:$0xff] }
 0x2d9   :  { %v825_v39 = vpop.f32.mrb[28].mxu1  ;;  %v971_v34 = vmax.f32 %v3304_v30, %v3306_v23 }
 0x2da   :  { %v3310_v37 = vadd.f32 %v825_v39, %v414_v32  ;;  %v827_v38 = vpop.f32.mrb[29].mxu1  ;;  %v424_v39 = vld [vmem:[#allocation2 + $0x130] sm:$0xff] }
 0x2db   :  { %v3312_v25 = vadd.f32 %v827_v38, %v415_v35  ;;  %972 = vmax.xlane.f32.xlu0 %v971_v34  ;;  %v425_v34 = vld [vmem:[#allocation2 + $0x138] sm:$0xff] }
 0x2dd   :  { %v831_v45 = vpop.f32.mrb[30].mxu1  ;;  %v974_v48 = vmax.f32 %v3310_v37, %v3312_v25 }
 0x2de   :  { %v3316_v51 = vadd.f32 %v831_v45, %v416_v42  ;;  %v833_v54 = vpop.f32.mrb[31].mxu1 }
 0x2df   :  { %v3318_v59 = vadd.f32 %v833_v54, %v417_v44  ;;  %975 = vmax.xlane.f32.xlu1 %v974_v48  ;;  %v426_v54 = vld [vmem:[#allocation2 + $0x140] sm:$0xff] }
 0x2e1   :  { %v837_v1 = vpop.f32.mrb[32].mxu1  ;;  %v977_v5 = vmax.f32 %v3316_v51, %v3318_v59 }
 0x2e2   :  { %v3322_v10 = vadd.f32 %v837_v1, %v418_v62  ;;  %v839_v11 = vpop.f32.mrb[33].mxu1  ;;  %v427_v62 = vld [vmem:[#allocation2 + $0x148] sm:$0xff] }
 0x2e3   :  { %v3324_v13 = vadd.f32 %v839_v11, %v419_v63  ;;  %978 = vmax.xlane.f32.xlu1 %v977_v5 }
 0x2e5   :  { %v843_v58 = vpop.f32.mrb[34].mxu1  ;;  %v980_v33 = vmax.f32 %v3322_v10, %v3324_v13 }
 0x2e6   :  { %v3328_v52 = vadd.f32 %v843_v58, %v420_v16  ;;  %v845_v55 = vpop.f32.mrb[35].mxu1  ;;  %v429_v58 = vld [vmem:[#allocation2 + $0x158] sm:$0xff] }
 0x2e7   :  { %v3330_v61 = vadd.f32 %v845_v55, %v421_v21  ;;  %981 = vmax.xlane.f32.xlu0 %v980_v33  ;;  %v428_v21 = vld [vmem:[#allocation2 + $0x150] sm:$0xff] }
 0x2e9   :  { %v849_v12 = vpop.f32.mrb[36].mxu1  ;;  %v983_v27 = vmax.f32 %v3328_v52, %v3330_v61 }
 0x2ea   :  { %v3334_v26 = vadd.f32 %v849_v12, %v422_v40  ;;  %v851_v32 = vpop.f32.mrb[37].mxu1 }
 0x2eb   :  { %v3336_v35 = vadd.f32 %v851_v32, %v423_v9  ;;  %984 = vmax.xlane.f32.xlu1 %v983_v27 }
 0x2ed   :  { %v855_v38 = vpop.f32.mrb[38].mxu1  ;;  %v986_v42 = vmax.f32 %v3334_v26, %v3336_v35 }
 0x2ee   :  { %v3340_v44 = vadd.f32 %v855_v38, %v424_v39  ;;  %v857_v45 = vpop.f32.mrb[39].mxu1  ;;  %v433_v38 = vld [vmem:[#allocation2 + $0x178] sm:$0xff] }
 0x2ef   :  { %v3342_v48 = vadd.f32 %v857_v45, %v425_v34  ;;  %987 = vmax.xlane.f32.xlu1 %v986_v42  ;;  %v432_v34 = vld [vmem:[#allocation2 + $0x170] sm:$0xff] }
 0x2f1   :  { %v861_v63 = vpop.f32.mrb[40].mxu1  ;;  %v989_v1 = vmax.f32 %v3340_v44, %v3342_v48 }
 0x2f2   :  { %v3346_v5 = vadd.f32 %v861_v63, %v426_v54  ;;  %v863_v11 = vpop.f32.mrb[41].mxu1  ;;  %v434_v63 = vld [vmem:[#allocation2 + $0x180] sm:$0xff] }
 0x2f3   :  { %v3348_v16 = vadd.f32 %v863_v11, %v427_v62  ;;  %990 = vmax.xlane.f32.xlu0 %v989_v1  ;;  %v435_v1 = vld [vmem:[#allocation2 + $0x188] sm:$0xff] }
 0x2f5   :  { %v867_v33 = vpop.f32.mrb[42].mxu1  ;;  %v992_v55 = vmax.f32 %v3346_v5, %v3348_v16 }
 0x2f6   :  { %v3352_v40 = vadd.f32 %v867_v33, %v428_v21  ;;  %v869_v9 = vpop.f32.mrb[43].mxu1 }
 0x2f7   :  { %v3354_v12 = vadd.f32 %v869_v9, %v429_v58  ;;  %993 = vmax.xlane.f32.xlu1 %v992_v55  ;;  %v436_v9 = vld [vmem:[#allocation2 + $0x190] sm:$0xff] }
 0x2f9   :  { %3930 = vst [vmem:[#allocation5_spill] sm:$0xff] %v3354_v12  ;;  %v3356_v27 = vpop.f32.mrb[44].mxu1  ;;  %v995_v32 = vmax.f32 %v3352_v40, %v3354_v12  ;;  %v438_v12 = vld [vmem:[#allocation2 + $0x1a0] sm:$0xff] }
 0x2fa   :  { %v3360_v39 = vpop.f32.mrb[45].mxu1 }
 0x2fb   :  { %996 = vmax.xlane.f32.xlu1 %v995_v32  ;;  %v437_v32 = vld [vmem:[#allocation2 + $0x198] sm:$0xff] }
 0x2fd   :  { %v879_v42 = vpop.f32.mrb[46].mxu1 }
 0x2fe   :  { %v3362_v45 = vadd.f32 %v879_v42, %v432_v34  ;;  %v881_v54 = vpop.f32.mrb[47].mxu1 }
 0x2ff   :  { %v3364_v62 = vadd.f32 %v881_v54, %v433_v38 }
 0x301   :  { %3931 = vst [vmem:[#allocation6_spill] sm:$0xff] %v3364_v62  ;;  %v885_v11 = vpop.f32.mrb[48].mxu1  ;;  %v1001_v21 = vmax.f32 %v3362_v45, %v3364_v62  ;;  %v439_v62 = vld [vmem:[#allocation2 + $0x1a8] sm:$0xff] }
 0x302   :  { %v3368_v58 = vadd.f32 %v885_v11, %v434_v63  ;;  %v887_v33 = vpop.f32.mrb[49].mxu1 }
 0x303   :  { %v3370_v55 = vadd.f32 %v887_v33, %v435_v1  ;;  %1002 = vmax.xlane.f32.xlu1 %v1001_v21 }
 0x304   :  { %3932 = vst [vmem:[#allocation7_spill] sm:$0xff] %v3368_v58 }
 0x305   :  { %3933 = vst [vmem:[#allocation8_spill] sm:$0xff] %v3370_v55  ;;  %v891_v19 = vpop.f32.mrb[50].mxu1  ;;  %v1004_v34 = vmax.f32 %v3368_v58, %v3370_v55 }
 0x306   :  { %v3374_v38 = vadd.f32 %v891_v19, %v436_v9  ;;  %v893_v42 = vpop.f32.mrb[51].mxu1  ;;  %v440_v19 = vld [vmem:[#allocation2 + $0x1b0] sm:$0xff]  ;;  %v441_v9 = vld [vmem:[#allocation2 + $0x1b8] sm:$0xff] }
 0x307   :  { %v3376_v54 = vadd.f32 %v893_v42, %v437_v32  ;;  %1005 = vmax.xlane.f32.xlu1 %v1004_v34 }
 0x308   :  { %3934 = vst [vmem:[#allocation9_spill] sm:$0xff] %v3374_v38 }
 0x309   :  { %3935 = vst [vmem:[#allocation10_spill] sm:$0xff] %v3376_v54  ;;  %v897_v63 = vpop.f32.mrb[52].mxu1  ;;  %2443 = vrot.lane.b32.xlu0 %v2955_v18, %s2673_s1  ;;  %v1007_v1 = vmax.f32 %v3374_v38, %v3376_v54  ;;  %v442_v18 = vld [vmem:[#allocation2 + $0x1c0] sm:$0xff]  ;;  %v443_v54 = vld [vmem:[#allocation2 + $0x1c8] sm:$0xff]  ;;  %v444_v38 = vld [vmem:[#allocation2 + $0x1d0] sm:$0xff] }
 0x30a   :  { %v3382_v11 = vadd.f32 %v897_v63, %v438_v12  ;;  %v899_v21 = vpop.f32.mrb[53].mxu1 }
 0x30b   :  { %v3384_v33 = vadd.f32 %v899_v21, %v439_v62  ;;  %1008 = vmax.xlane.f32.xlu1 %v1007_v1 }
 0x30c   :  { %3936 = vst [vmem:[#allocation11_spill] sm:$0xff] %v3382_v11 }
 0x30d   :  { %3937 = vst [vmem:[#allocation12_spill] sm:$0xff] %v3384_v33  ;;  %v903_v32 = vpop.f32.mrb[54].mxu1  ;;  %v1010_v34 = vmax.f32 %v3382_v11, %v3384_v33  ;;  %v445_v33 = vld [vmem:[#allocation2 + $0x1d8] sm:$0xff] }
 0x30e   :  { %v3388_v42 = vadd.f32 %v903_v32, %v440_v19  ;;  %v905_v55 = vpop.f32.mrb[55].mxu1 }
 0x30f   :  { %v3390_v58 = vadd.f32 %v905_v55, %v441_v9  ;;  %1011 = vmax.xlane.f32.xlu1 %v1010_v34 }
 0x311   :  { %3938 = vst [vmem:[#allocation13_spill] sm:$0xff] %v3390_v58  ;;  %v909_v12 = vpop.f32.mrb[56].mxu1  ;;  %v1013_v62 = vmax.f32 %v3388_v42, %v3390_v58  ;;  %v431_v58 = vld [vmem:[#allocation2 + $0x168] sm:$0xff] }
 0x312   :  { %v3394_v63 = vadd.f32 %v909_v12, %v442_v18  ;;  %v911_v1 = vpop.f32.mrb[57].mxu1 }
 0x313   :  { %v3396_v21 = vadd.f32 %v911_v1, %v443_v54  ;;  %1014 = vmax.xlane.f32.xlu1 %v1013_v62  ;;  %v430_v1 = vld [vmem:[#allocation2 + $0x160] sm:$0xff] }
 0x314   :  { %3939 = vst [vmem:[#allocation14_spill] sm:$0xff] %v3394_v63 }
 0x315   :  { %3940 = vst [vmem:[#allocation15_spill] sm:$0xff] %v3396_v21  ;;  %v915_v19 = vpop.f32.mrb[58].mxu1  ;;  %v1016_v55 = vmax.f32 %v3394_v63, %v3396_v21  ;;  %v3411_v21 = vadd.f32 %v3356_v27, %v430_v1 }
 0x316   :  { %v3400_v9 = vadd.f32 %v915_v19, %v444_v38  ;;  %v917_v32 = vpop.f32.mrb[59].mxu1  ;;  %v3414_v38 = vadd.f32 %v3360_v39, %v431_v58  ;;  %v449_v19 = vld [vmem:[#allocation2 + $0x1f8] sm:$0xff] }
 0x317   :  { %v3402_v34 = vadd.f32 %v917_v32, %v445_v33  ;;  %1017 = vmax.xlane.f32.xlu1 %v1016_v55  ;;  %v448_v33 = vld [vmem:[#allocation2 + $0x1f0] sm:$0xff] }
 0x318   :  { %3941 = vst [vmem:[#allocation16_spill] sm:$0xff] %v3400_v9  ;;  %v998_v63 = vmax.f32 %v3411_v21, %v3414_v38 }
 0x319   :  { %3942 = vst [vmem:[#allocation17_spill] sm:$0xff] %v3402_v34  ;;  %v3404_v11 = vpop.f32.mrb[60].mxu1  ;;  %v1019_v18 = vmax.f32 %v3400_v9, %v3402_v34 }
 0x31a   :  { %v3408_v54 = vpop.f32.mrb[61].mxu1 }
 0x31b   :  { %1020 = vmax.xlane.f32.xlu1 %v1019_v18 }
 0x31d   :  { %v927_v12 = vpop.f32.mrb[62].mxu1 }
 0x31e   :  { %v929_v62 = vpop.f32.mrb[63].mxu1  ;;  %v3416_v55 = vadd.f32 %v927_v12, %v448_v33 }
 0x31f   :  { %v3418_v32 = vadd.f32 %v929_v62, %v449_v19 }
 0x321   :  { %3943 = vst [vmem:[#allocation18_spill] sm:$0xff] %v3418_v32  ;;  %v1025_v18 = vmax.f32 %v3416_v55, %v3418_v32 }
 0x328   :  { %999 = vmax.xlane.f32.xlu0 %v998_v63 }
 0x32c   :  { %1026 = vmax.xlane.f32.xlu0 %v1025_v18 }
 0x334   :  { %v934_v34 = vpop.xlane.xlu0 %933 }
 0x335   :  { %v1028_v27 = vsub.f32 %v3226_v47, %v934_v34  ;;  %v1029_v39 = vsub.f32 %v3228_v50, %v934_v34 }
 0x337   :  { %v1092_v58 = vmul.f32 1.442695, %v1028_v27  ;;  %v1094_v1 = vmul.f32 1.442695, %v1029_v39 }
 0x338   :  { %v937_v9 = vpop.xlane.xlu1 %936 }
 0x339   :  { %2452 = vpow2.f32 %v1092_v58  ;;  %v1030_v12 = vsub.f32 %v3232_v57, %v937_v9  ;;  %v1031_v62 = vsub.f32 %v3234_v60, %v937_v9 }
 0x33a   :  { %2454 = vpow2.f32 %v1094_v1 }
 0x33b   :  { %v1096_v33 = vmul.f32 1.442695, %v1030_v12  ;;  %v1098_v63 = vmul.f32 1.442695, %v1031_v62 }
 0x33c   :  { %v940_v19 = vpop.xlane.xlu0 %939 }
 0x33d   :  { %2456 = vpow2.f32 %v1096_v33  ;;  %v1032_v18 = vsub.f32 %v3238_v4, %v940_v19  ;;  %v1033_v32 = vsub.f32 %v3240_v7, %v940_v19 }
 0x33e   :  { %2458 = vpow2.f32 %v1098_v63 }
 0x33f   :  { %v1100_v47 = vmul.f32 1.442695, %v1032_v18  ;;  %v1102_v50 = vmul.f32 1.442695, %v1033_v32 }
 0x340   :  { %v943_v34 = vpop.xlane.xlu0 %942 }
 0x341   :  { %2460 = vpow2.f32 %v1100_v47  ;;  %v1034_v27 = vsub.f32 %v3244_v14, %v943_v34  ;;  %v1035_v57 = vsub.f32 %v3246_v17, %v943_v34 }
 0x342   :  { %2462 = vpow2.f32 %v1102_v50 }
 0x343   :  { %v3432_v60 = vpop.eup %2452  ;;  %v1104_v9 = vmul.f32 1.442695, %v1034_v27  ;;  %v1106_v39 = vmul.f32 1.442695, %v1035_v57 }
 0x344   :  { %v3434_v58 = vpop.eup %2454  ;;  %v946_v1 = vpop.xlane.xlu1 %945 }
 0x345   :  { %2464 = vpow2.f32 %v1104_v9  ;;  %v1036_v4 = vsub.f32 %v3250_v15, %v946_v1  ;;  %v1037_v7 = vsub.f32 %v3252_v43, %v946_v1  ;;  %v1220_v32 = vadd.f32 %v3434_v58, %v3432_v60 }
 0x346   :  { %2466 = vpow2.f32 %v1106_v39 }
 0x347   :  { %v3440_v14 = vpop.eup %2456  ;;  %v1108_v17 = vmul.f32 1.442695, %v1036_v4  ;;  %v1110_v12 = vmul.f32 1.442695, %v1037_v7  ;;  %1221 = vadd.xlane.f32.xlu1 %v1220_v32 }
 0x348   :  { %v3442_v62 = vpop.eup %2458  ;;  %v949_v33 = vpop.xlane.xlu0 %948 }
 0x349   :  { %2468 = vpow2.f32 %v1108_v17  ;;  %v1038_v63 = vsub.f32 %v3256_v3, %v949_v33  ;;  %v1039_v19 = vsub.f32 %v3258_v6, %v949_v33  ;;  %v1223_v15 = vadd.f32 %v3442_v62, %v3440_v14 }
 0x34a   :  { %2470 = vpow2.f32 %v1110_v12 }
 0x34b   :  { %v3448_v43 = vpop.eup %2460  ;;  %v1112_v18 = vmul.f32 1.442695, %v1038_v63  ;;  %v1114_v47 = vmul.f32 1.442695, %v1039_v19  ;;  %1224 = vadd.xlane.f32.xlu0 %v1223_v15 }
 0x34c   :  { %v3450_v50 = vpop.eup %2462  ;;  %v952_v34 = vpop.xlane.xlu1 %951 }
 0x34d   :  { %2472 = vpow2.f32 %v1112_v18  ;;  %v1040_v27 = vsub.f32 %v3262_v24, %v952_v34  ;;  %v1041_v57 = vsub.f32 %v3264_v31, %v952_v34  ;;  %v1226_v3 = vadd.f32 %v3450_v50, %v3448_v43 }
 0x34e   :  { %2474 = vpow2.f32 %v1114_v47 }
 0x34f   :  { %v3456_v6 = vpop.eup %2464  ;;  %v1116_v9 = vmul.f32 1.442695, %v1040_v27  ;;  %v1118_v39 = vmul.f32 1.442695, %v1041_v57  ;;  %1227 = vadd.xlane.f32.xlu0 %v1226_v3 }
 0x350   :  { %v3458_v1 = vpop.eup %2466  ;;  %v955_v4 = vpop.xlane.xlu0 %954 }
 0x351   :  { %2476 = vpow2.f32 %v1116_v9  ;;  %v1042_v7 = vsub.f32 %v3268_v36, %v955_v4  ;;  %v1043_v32 = vsub.f32 %v3270_v0, %v955_v4  ;;  %v1229_v24 = vadd.f32 %v3458_v1, %v3456_v6 }
 0x352   :  { %2478 = vpow2.f32 %v1118_v39 }
 0x353   :  { %v3464_v31 = vpop.eup %2468  ;;  %v1120_v17 = vmul.f32 1.442695, %v1042_v7  ;;  %v1122_v12 = vmul.f32 1.442695, %v1043_v32  ;;  %1230 = vadd.xlane.f32.xlu0 %v1229_v24 }
 0x354   :  { %v3466_v33 = vpop.eup %2470  ;;  %v958_v63 = vpop.xlane.xlu1 %957 }
 0x355   :  { %2480 = vpow2.f32 %v1120_v17  ;;  %v1044_v19 = vsub.f32 %v3274_v49, %v958_v63  ;;  %v1045_v15 = vsub.f32 %v3276_v41, %v958_v63  ;;  %v1232_v36 = vadd.f32 %v3466_v33, %v3464_v31 }
 0x356   :  { %2482 = vpow2.f32 %v1122_v12 }
 0x357   :  { %v3472_v0 = vpop.eup %2472  ;;  %v1124_v18 = vmul.f32 1.442695, %v1044_v19  ;;  %v1126_v47 = vmul.f32 1.442695, %v1045_v15  ;;  %1233 = vadd.xlane.f32.xlu0 %v1232_v36 }
 0x358   :  { %v3474_v34 = vpop.eup %2474  ;;  %2448 = vrot.lane.b32.xlu1 %v2967_v22, %s2673_s1  ;;  %v961_v27 = vpop.xlane.xlu0 %960 }
 0x359   :  { %2484 = vpow2.f32 %v1124_v18  ;;  %v1046_v49 = vsub.f32 %v3280_v53, %v961_v27  ;;  %v1047_v41 = vsub.f32 %v3282_v56, %v961_v27  ;;  %v1235_v57 = vadd.f32 %v3474_v34, %v3472_v0 }
 0x35a   :  { %2486 = vpow2.f32 %v1126_v47 }
 0x35b   :  { %v3482_v3 = vpop.eup %2476  ;;  %v1128_v9 = vmul.f32 1.442695, %v1046_v49  ;;  %v1130_v39 = vmul.f32 1.442695, %v1047_v41  ;;  %1236 = vadd.xlane.f32.xlu0 %v1235_v57 }
 0x35c   :  { %v3484_v4 = vpop.eup %2478  ;;  %v964_v7 = vpop.xlane.xlu1 %963 }
 0x35d   :  { %2488 = vpow2.f32 %v1128_v9  ;;  %v1048_v22 = vsub.f32 %v3286_v2, %v964_v7  ;;  %v1049_v32 = vsub.f32 %v3288_v8, %v964_v7  ;;  %v1238_v53 = vadd.f32 %v3484_v4, %v3482_v3 }
 0x35e   :  { %2490 = vpow2.f32 %v1130_v39 }
 0x35f   :  { %v3490_v56 = vpop.eup %2480  ;;  %v1132_v24 = vmul.f32 1.442695, %v1048_v22  ;;  %v1134_v17 = vmul.f32 1.442695, %v1049_v32  ;;  %1239 = vadd.xlane.f32.xlu0 %v1238_v53 }
 0x360   :  { %v3492_v12 = vpop.eup %2482  ;;  %v967_v63 = vpop.xlane.xlu0 %966 }
 0x361   :  { %2492 = vpow2.f32 %v1132_v24  ;;  %v1050_v19 = vsub.f32 %v3292_v20, %v967_v63  ;;  %v1051_v15 = vsub.f32 %v3294_v46, %v967_v63  ;;  %v1241_v2 = vadd.f32 %v3492_v12, %v3490_v56 }
 0x362   :  { %2494 = vpow2.f32 %v1134_v17 }
 0x363   :  { %v3498_v8 = vpop.eup %2484  ;;  %v1136_v36 = vmul.f32 1.442695, %v1050_v19  ;;  %v1138_v18 = vmul.f32 1.442695, %v1051_v15  ;;  %1242 = vadd.xlane.f32.xlu0 %v1241_v2 }
 0x364   :  { %v3500_v47 = vpop.eup %2486  ;;  %v970_v27 = vpop.xlane.xlu1 %969 }
 0x365   :  { %2496 = vpow2.f32 %v1136_v36  ;;  %v1052_v49 = vsub.f32 %v3298_v29, %v970_v27  ;;  %v1053_v41 = vsub.f32 %v3300_v28, %v970_v27  ;;  %v1244_v20 = vadd.f32 %v3500_v47, %v3498_v8 }
 0x366   :  { %2498 = vpow2.f32 %v1138_v18 }
 0x367   :  { %v3506_v46 = vpop.eup %2488  ;;  %v1140_v57 = vmul.f32 1.442695, %v1052_v49  ;;  %v1142_v9 = vmul.f32 1.442695, %v1053_v41  ;;  %1245 = vadd.xlane.f32.xlu0 %v1244_v20  ;;  %v446_v20 = vld [vmem:[#allocation2 + $0x1e0] sm:$0xff] }
 0x368   :  { %v3508_v39 = vpop.eup %2490  ;;  %v973_v7 = vpop.xlane.xlu0 %972 }
 0x369   :  { %2500 = vpow2.f32 %v1140_v57  ;;  %v1054_v22 = vsub.f32 %v3304_v30, %v973_v7  ;;  %v1055_v32 = vsub.f32 %v3306_v23, %v973_v7  ;;  %v1247_v29 = vadd.f32 %v3508_v39, %v3506_v46  ;;  %v447_v57 = vld [vmem:[#allocation2 + $0x1e8] sm:$0xff] }
 0x36a   :  { %2502 = vpow2.f32 %v1142_v9 }
 0x36b   :  { %v3514_v28 = vpop.eup %2492  ;;  %v1144_v53 = vmul.f32 1.442695, %v1054_v22  ;;  %v1146_v24 = vmul.f32 1.442695, %v1055_v32  ;;  %1248 = vadd.xlane.f32.xlu0 %v1247_v29 }
 0x36c   :  { %v3516_v17 = vpop.eup %2494  ;;  %v976_v63 = vpop.xlane.xlu1 %975 }
 0x36d   :  { %2504 = vpow2.f32 %v1144_v53  ;;  %v1056_v19 = vsub.f32 %v3310_v37, %v976_v63  ;;  %v1057_v15 = vsub.f32 %v3312_v25, %v976_v63  ;;  %v1250_v30 = vadd.f32 %v3516_v17, %v3514_v28 }
 0x36e   :  { %2506 = vpow2.f32 %v1146_v24  ;;  %v3539_v53 = vadd.f32 %v3404_v11, %v446_v20  ;;  %v3542_v24 = vadd.f32 %v3408_v54, %v447_v57 }
 0x36f   :  { %v3522_v23 = vpop.eup %2496  ;;  %v1148_v2 = vmul.f32 1.442695, %v1056_v19  ;;  %v1150_v36 = vmul.f32 1.442695, %v1057_v15  ;;  %1251 = vadd.xlane.f32.xlu0 %v1250_v30 }
 0x370   :  { %v3524_v18 = vpop.eup %2498  ;;  %v979_v27 = vpop.xlane.xlu1 %978  ;;  %v1022_v54 = vmax.f32 %v3539_v53, %v3542_v24 }
 0x371   :  { %2508 = vpow2.f32 %v1148_v2  ;;  %v1058_v49 = vsub.f32 %v3316_v51, %v979_v27  ;;  %v1059_v41 = vsub.f32 %v3318_v59, %v979_v27  ;;  %v1253_v37 = vadd.f32 %v3524_v18, %v3522_v23 }
 0x372   :  { %2510 = vpow2.f32 %v1150_v36 }
 0x373   :  { %v3530_v25 = vpop.eup %2500  ;;  %v1152_v9 = vmul.f32 1.442695, %v1058_v49  ;;  %v1154_v7 = vmul.f32 1.442695, %v1059_v41  ;;  %1254 = vadd.xlane.f32.xlu0 %v1253_v37 }
 0x374   :  { %v3532_v22 = vpop.eup %2502  ;;  %v982_v32 = vpop.xlane.xlu0 %981 }
 0x375   :  { %2512 = vpow2.f32 %v1152_v9  ;;  %v1060_v29 = vsub.f32 %v3322_v10, %v982_v32  ;;  %v1061_v51 = vsub.f32 %v3324_v13, %v982_v32  ;;  %v1256_v59 = vadd.f32 %v3532_v22, %v3530_v25 }
 0x376   :  { %2514 = vpow2.f32 %v1154_v7 }
 0x377   :  { %v3544_v63 = vpop.eup %2504  ;;  %v1156_v19 = vmul.f32 1.442695, %v1060_v29  ;;  %v1158_v15 = vmul.f32 1.442695, %v1061_v51  ;;  %1257 = vadd.xlane.f32.xlu0 %v1256_v59 }
 0x378   :  { %v3546_v30 = vpop.eup %2506  ;;  %v985_v10 = vpop.xlane.xlu1 %984 }
 0x379   :  { %2516 = vpow2.f32 %v1156_v19  ;;  %v1062_v13 = vsub.f32 %v3328_v52, %v985_v10  ;;  %v1063_v2 = vsub.f32 %v3330_v61, %v985_v10  ;;  %v1259_v11 = vadd.f32 %v3546_v30, %v3544_v63 }
 0x37a   :  { %2518 = vpow2.f32 %v1158_v15 }
 0x37b   :  { %v3554_v36 = vpop.eup %2508  ;;  %v1160_v27 = vmul.f32 1.442695, %v1062_v13  ;;  %v1162_v49 = vmul.f32 1.442695, %v1063_v2  ;;  %1260 = vadd.xlane.f32.xlu0 %v1259_v11 }
 0x37c   :  { %v3556_v41 = vpop.eup %2510  ;;  %1023 = vmax.xlane.f32.xlu1 %v1022_v54  ;;  %v988_v37 = vpop.xlane.xlu1 %987 }
 0x37d   :  { %2520 = vpow2.f32 %v1160_v27  ;;  %v1064_v52 = vsub.f32 %v3334_v26, %v988_v37  ;;  %v1065_v61 = vsub.f32 %v3336_v35, %v988_v37  ;;  %v1262_v20 = vadd.f32 %v3556_v41, %v3554_v36 }
 0x37e   :  { %2522 = vpow2.f32 %v1162_v49 }
 0x37f   :  { %v3562_v57 = vpop.eup %2512  ;;  %v1164_v9 = vmul.f32 1.442695, %v1064_v52  ;;  %v1166_v7 = vmul.f32 1.442695, %v1065_v61 }
 0x380   :  { %v3564_v32 = vpop.eup %2514  ;;  %1263 = vadd.xlane.f32.xlu1 %v1262_v20  ;;  %v991_v29 = vpop.xlane.xlu0 %990 }
 0x381   :  { %2524 = vpow2.f32 %v1164_v9  ;;  %v1066_v51 = vsub.f32 %v3340_v44, %v991_v29  ;;  %v1067_v59 = vsub.f32 %v3342_v48, %v991_v29  ;;  %v1265_v26 = vadd.f32 %v3564_v32, %v3562_v57 }
 0x382   :  { %2526 = vpow2.f32 %v1166_v7  ;;  %v3944_v7 = vld [vmem:[#allocation5_spill] sm:$0xff] }
 0x383   :  { %v3570_v35 = vpop.eup %2516  ;;  %v1168_v19 = vmul.f32 1.442695, %v1066_v51  ;;  %v1170_v15 = vmul.f32 1.442695, %v1067_v59  ;;  %1266 = vadd.xlane.f32.xlu0 %v1265_v26 }
 0x384   :  { %v3572_v10 = vpop.eup %2518  ;;  %v994_v13 = vpop.xlane.xlu1 %993 }
 0x385   :  { %v2444_v2 = vpop.permute.xlu0 %2443  ;;  %2528 = vpow2.f32 %v1168_v19  ;;  %v1068_v11 = vsub.f32 %v3346_v5, %v994_v13  ;;  %v1069_v44 = vsub.f32 %v3348_v16, %v994_v13  ;;  %v1268_v27 = vadd.f32 %v3572_v10, %v3570_v35 }
 0x386   :  { %v2446_v54 = vunpack.i.h.bf16 %v2444_v2  ;;  %2530 = vpow2.f32 %v1170_v15  ;;  %v2445_v48 = vunpack.i.l.bf16 %v2444_v2  ;;  %v3945_v19 = vmov 0.0|0.0  }
 0x387   :  { %v3578_v49 = vpop.eup %2520  ;;  %v1172_v37 = vmul.f32 1.442695, %v1068_v11  ;;  %v1174_v52 = vmul.f32 1.442695, %v1069_v44  ;;  %1269 = vadd.xlane.f32.xlu1 %v1268_v27 }
 0x388   :  { %v3580_v61 = vpop.eup %2522  ;;  %v2249_v20 = vpack.c.bf16 %v2446_v54, %v2445_v48  ;;  %v997_v9 = vpop.xlane.xlu1 %996  ;;  %v3947_v54 = vld [vmem:[#allocation6_spill] sm:$0xff] }
 0x389   :  { %2532 = vpow2.f32 %v1172_v37  ;;  %v1070_v5 = vsub.f32 %v3352_v40, %v997_v9  ;;  %v1071_v16 = vsub.f32 %v3944_v7, %v997_v9  ;;  %v1271_v29 = vadd.f32 %v3580_v61, %v3578_v49 }
 0x38a   :  { %2534 = vpow2.f32 %v1174_v52  ;;  %2250 = vmatpush1.bf16.msra.mxu0 %v2249_v20  ;;  %2284 = vmatpush1.bf16.msra.mxu1 %v2249_v20 }
 0x38b   :  { %v3586_v51 = vpop.eup %2524  ;;  %v1176_v59 = vmul.f32 1.442695, %v1070_v5  ;;  %v1178_v26 = vmul.f32 1.442695, %v1071_v16  ;;  %1272 = vadd.xlane.f32.xlu0 %v1271_v29  ;;  %2251 = vmatprep.subr.bf16.mxu0 %v3945_v19 }
 0x38c   :  { %v3589_v15 = vpop.eup %2526  ;;  %2269 = vmatprep.subr.bf16.mxu1 %v3945_v19  ;;  %v3953_v19 = vld [vmem:[#allocation10_spill] sm:$0xff] }
 0x38d   :  { %2536 = vpow2.f32 %v1176_v59  ;;  %v1274_v40 = vadd.f32 %v3589_v15, %v3586_v51  ;;  %v3952_v59 = vld [vmem:[#allocation9_spill] sm:$0xff] }
 0x38e   :  { %2538 = vpow2.f32 %v1178_v26 }
 0x38f   :  { %v3594_v13 = vpop.eup %2528  ;;  %1275 = vadd.xlane.f32.xlu1 %v1274_v40 }
 0x390   :  { %3946 = vst [vmem:[#allocation5_spill] sm:$0xff] %v3594_v13  ;;  %v3596_v2 = vpop.eup %2530  ;;  %v1003_v11 = vpop.xlane.xlu1 %1002 }
 0x391   :  { %v1074_v44 = vsub.f32 %v3362_v45, %v1003_v11  ;;  %v1075_v48 = vsub.f32 %v3947_v54, %v1003_v11  ;;  %v1277_v27 = vadd.f32 %v3596_v2, %v3594_v13 }
 0x393   :  { %v3602_v37 = vpop.eup %2532  ;;  %v1184_v52 = vmul.f32 1.442695, %v1074_v44  ;;  %v1186_v20 = vmul.f32 1.442695, %v1075_v48  ;;  %1278 = vadd.xlane.f32.xlu0 %v1277_v27 }
 0x394   :  { %3948 = vst [vmem:[#allocation6_spill] sm:$0xff] %v3602_v37  ;;  %v3604_v9 = vpop.eup %2534  ;;  %v1006_v5 = vpop.xlane.xlu1 %1005 }
 0x395   :  { %3949 = vst [vmem:[#allocation19_spill] sm:$0xff] %v3604_v9  ;;  %2540 = vpow2.f32 %v1184_v52  ;;  %v1280_v7 = vadd.f32 %v3604_v9, %v3602_v37  ;;  %v3956_v37 = vld [vmem:[#allocation13_spill] sm:$0xff] }
 0x396   :  { %2542 = vpow2.f32 %v1186_v20  ;;  %v3960_v9 = vld [vmem:[#allocation17_spill] sm:$0xff] }
 0x397   :  { %v3608_v16 = vpop.eup %2536  ;;  %1281 = vadd.xlane.f32.xlu1 %v1280_v7 }
 0x398   :  { %3950 = vst [vmem:[#allocation20_spill] sm:$0xff] %v3608_v16  ;;  %v3610_v45 = vpop.eup %2538  ;;  %v1009_v29 = vpop.xlane.xlu1 %1008 }
 0x399   :  { %3951 = vst [vmem:[#allocation21_spill] sm:$0xff] %v3610_v45  ;;  %v1078_v26 = vsub.f32 %v3952_v59, %v1009_v29  ;;  %v1079_v40 = vsub.f32 %v3953_v19, %v1009_v29  ;;  %v1283_v11 = vadd.f32 %v3610_v45, %v3608_v16 }
 0x39b   :  { %v1192_v44 = vmul.f32 1.442695, %v1078_v26  ;;  %v1194_v54 = vmul.f32 1.442695, %v1079_v40  ;;  %1284 = vadd.xlane.f32.xlu0 %v1283_v11 }
 0x39c   :  { %v1012_v48 = vpop.xlane.xlu1 %1011 }
 0x39d   :  { %2544 = vpow2.f32 %v1192_v44 }
 0x39e   :  { %2546 = vpow2.f32 %v1194_v54  ;;  %v3959_v54 = vld [vmem:[#allocation16_spill] sm:$0xff] }
 0x39f   :  { %v3616_v27 = vpop.eup %2540 }
 0x3a0   :  { %3954 = vst [vmem:[#allocation9_spill] sm:$0xff] %v3616_v27  ;;  %v3618_v52 = vpop.eup %2542  ;;  %v1015_v20 = vpop.xlane.xlu1 %1014 }
 0x3a1   :  { %3955 = vst [vmem:[#allocation10_spill] sm:$0xff] %v3618_v52  ;;  %v1082_v7 = vsub.f32 %v3388_v42, %v1015_v20  ;;  %v1083_v59 = vsub.f32 %v3956_v37, %v1015_v20  ;;  %v1289_v29 = vadd.f32 %v3618_v52, %v3616_v27 }
 0x3a3   :  { %v1200_v19 = vmul.f32 1.442695, %v1082_v7  ;;  %v1202_v16 = vmul.f32 1.442695, %v1083_v59  ;;  %1290 = vadd.xlane.f32.xlu0 %v1289_v29  ;;  %v3963_v59 = vld [vmem:[#allocation7_spill] sm:$0xff] }
 0x3a4   :  { %v1018_v26 = vpop.xlane.xlu1 %1017  ;;  %v1076_v29 = vsub.f32 %v3963_v59, %v1006_v5 }
 0x3a5   :  { %2548 = vpow2.f32 %v1200_v19 }
 0x3a6   :  { %2550 = vpow2.f32 %v1202_v16 }
 0x3a7   :  { %v3624_v40 = vpop.eup %2544 }
 0x3a8   :  { %3957 = vst [vmem:[#allocation13_spill] sm:$0xff] %v3624_v40  ;;  %v3626_v11 = vpop.eup %2546  ;;  %v1021_v44 = vpop.xlane.xlu1 %1020 }
 0x3a9   :  { %3958 = vst [vmem:[#allocation22_spill] sm:$0xff] %v3626_v11  ;;  %v1086_v45 = vsub.f32 %v3959_v54, %v1021_v44  ;;  %v1087_v42 = vsub.f32 %v3960_v9, %v1021_v44  ;;  %v1295_v37 = vadd.f32 %v3626_v11, %v3624_v40  ;;  %v3964_v54 = vld [vmem:[#allocation8_spill] sm:$0xff]  ;;  %v1188_v44 = vmul.f32 1.442695, %v1076_v29 }
 0x3aa   :  { %v1077_v9 = vsub.f32 %v3964_v54, %v1006_v5  ;;  %v3970_v54 = vld [vmem:[#allocation14_spill] sm:$0xff] }
 0x3ab   :  { %v1208_v20 = vmul.f32 1.442695, %v1086_v45  ;;  %v1210_v27 = vmul.f32 1.442695, %v1087_v42  ;;  %1296 = vadd.xlane.f32.xlu0 %v1295_v37 }
 0x3ac   :  { %v1190_v13 = vmul.f32 1.442695, %v1077_v9 }
 0x3ad   :  { %2552 = vpow2.f32 %v1208_v20  ;;  %v3967_v20 = vld [vmem:[#allocation11_spill] sm:$0xff] }
 0x3ae   :  { %2554 = vpow2.f32 %v1210_v27  ;;  %v1080_v40 = vsub.f32 %v3967_v20, %v1012_v48  ;;  %v1084_v20 = vsub.f32 %v3970_v54, %v1018_v26 }
 0x3af   :  { %v3632_v7 = vpop.eup %2548  ;;  %2556 = vpow2.f32 %v1188_v44  ;;  %v3971_v44 = vld [vmem:[#allocation15_spill] sm:$0xff] }
 0x3b0   :  { %3961 = vst [vmem:[#allocation16_spill] sm:$0xff] %v3632_v7  ;;  %v3634_v16 = vpop.eup %2550  ;;  %v1196_v29 = vmul.f32 1.442695, %v1080_v40 }
 0x3b1   :  { %3962 = vst [vmem:[#allocation17_spill] sm:$0xff] %v3634_v16  ;;  %v1301_v19 = vadd.f32 %v3634_v16, %v3632_v7  ;;  %v3968_v7 = vld [vmem:[#allocation12_spill] sm:$0xff] }
 0x3b3   :  { %1302 = vadd.xlane.f32.xlu0 %v1301_v19  ;;  %v1081_v19 = vsub.f32 %v3968_v7, %v1012_v48  ;;  %v1085_v48 = vsub.f32 %v3971_v44, %v1018_v26  ;;  %v1204_v7 = vmul.f32 1.442695, %v1084_v20 }
 0x3b5   :  { %v1000_v52 = vpop.xlane.xlu0 %999  ;;  %v1198_v9 = vmul.f32 1.442695, %v1081_v19 }
 0x3b6   :  { %v1072_v45 = vsub.f32 %v3411_v21, %v1000_v52  ;;  %v1073_v42 = vsub.f32 %v3414_v38, %v1000_v52  ;;  %v3969_v38 = vld [vmem:[#allocation18_spill] sm:$0xff] }
 0x3b7   :  { %v3642_v37 = vpop.eup %2552 }
 0x3b8   :  { %3965 = vst [vmem:[#allocation7_spill] sm:$0xff] %v3642_v37  ;;  %v3644_v27 = vpop.eup %2554  ;;  %v1180_v11 = vmul.f32 1.442695, %v1072_v45  ;;  %v1182_v59 = vmul.f32 1.442695, %v1073_v42 }
 0x3b9   :  { %3966 = vst [vmem:[#allocation8_spill] sm:$0xff] %v3644_v27  ;;  %v1027_v16 = vpop.xlane.xlu0 %1026  ;;  %v1307_v5 = vadd.f32 %v3644_v27, %v3642_v37 }
 0x3ba   :  { %2558 = vpow2.f32 %v1180_v11  ;;  %v1090_v21 = vsub.f32 %v3416_v55, %v1027_v16  ;;  %v1091_v52 = vsub.f32 %v3969_v38, %v1027_v16  ;;  %v1206_v11 = vmul.f32 1.442695, %v1085_v48  ;;  %v3654_v55 = vpop.eup %2556 }
 0x3bb   :  { %2560 = vpow2.f32 %v1182_v59  ;;  %1308 = vadd.xlane.f32.xlu0 %v1307_v5  ;;  %3972 = vst [vmem:[#allocation11_spill] sm:$0xff] %v3654_v55 }
 0x3bc   :  { %v1216_v45 = vmul.f32 1.442695, %v1090_v21  ;;  %v1218_v42 = vmul.f32 1.442695, %v1091_v52  ;;  %2562 = vpow2.f32 %v1190_v13 }
 0x3be   :  { %2564 = vpow2.f32 %v1216_v45 }
 0x3bf   :  { %2566 = vpow2.f32 %v1218_v42 }
 0x3c0   :  { %2568 = vpow2.f32 %v1196_v29 }
 0x3c1   :  { %2570 = vpow2.f32 %v1198_v9 }
 0x3c2   :  { %2572 = vpow2.f32 %v1204_v7 }
 0x3c3   :  { %2574 = vpow2.f32 %v1206_v11 }
 0x3c4   :  { %v3656_v16 = vpop.eup %2558 }
 0x3c5   :  { %v3658_v40 = vpop.eup %2560 }
 0x3c6   :  { %v1286_v13 = vadd.f32 %v3658_v40, %v3656_v16  ;;  %v3662_v59 = vpop.eup %2562 }
 0x3c7   :  { %3973 = vst [vmem:[#allocation12_spill] sm:$0xff] %v3662_v59  ;;  %v1292_v21 = vadd.f32 %v3662_v59, %v3654_v55 }
 0x3c8   :  { %v3664_v26 = vpop.eup %2564  ;;  %1287 = vadd.xlane.f32.xlu1 %v1286_v13 }
 0x3c9   :  { %v3666_v19 = vpop.eup %2566 }
 0x3ca   :  { %3974 = vst [vmem:[#allocation18_spill] sm:$0xff] %v3666_v19  ;;  %v3668_v5 = vpop.eup %2568  ;;  %v1313_v38 = vadd.f32 %v3666_v19, %v3664_v26 }
 0x3cb   :  { %3975 = vst [vmem:[#allocation14_spill] sm:$0xff] %v3668_v5  ;;  %v3674_v52 = vpop.eup %2570 }
 0x3cc   :  { %3976 = vst [vmem:[#allocation15_spill] sm:$0xff] %v3674_v52  ;;  %1293 = vadd.xlane.f32.xlu1 %v1292_v21  ;;  %1314 = vadd.xlane.f32.xlu0 %v1313_v38  ;;  %v3676_v29 = vpop.eup %2572  ;;  %v1298_v54 = vadd.f32 %v3674_v52, %v3668_v5 }
 0x3cd   :  { %3977 = vst [vmem:[#allocation23_spill] sm:$0xff] %v3676_v29  ;;  %v3680_v20 = vpop.eup %2574 }
 0x3ce   :  { %3978 = vst [vmem:[#allocation24_spill] sm:$0xff] %v3680_v20  ;;  %v1304_v45 = vadd.f32 %v3680_v20, %v3676_v29 }
 0x3d0   :  { %1299 = vadd.xlane.f32.xlu1 %v1298_v54 }
 0x3d4   :  { %v1222_v42 = vpop.xlane.xlu1 %1221  ;;  %1305 = vadd.xlane.f32.xlu1 %v1304_v45 }
 0x3d5   :  { %2576 = vrcp.f32 %v1222_v42 }
 0x3d8   :  { %v2449_v9 = vpop.permute.xlu1 %2448  ;;  %v1225_v44 = vpop.xlane.xlu0 %1224 }
 0x3d9   :  { %v2451_v48 = vunpack.i.h.bf16 %v2449_v9  ;;  %v2450_v7 = vunpack.i.l.bf16 %v2449_v9  ;;  %2578 = vrcp.f32 %v1225_v44 }
 0x3db   :  { %v2252_v11 = vpack.c.bf16 %v2451_v48, %v2450_v7 }
 0x3dc   :  { %v1228_v13 = vpop.xlane.xlu0 %1227 }
 0x3dd   :  { %2580 = vrcp.f32 %v1228_v13  ;;  %2253 = vmatpush1.bf16.msra.mxu0 %v2252_v11  ;;  %2285 = vmatpush1.bf16.msra.mxu1 %v2252_v11 }
 0x3df   :  { %v2577_v21 = vpop.eup %2576 }
 0x3e0   :  { %v1348_v38 = vmul.f32 %v2577_v21, %v1222_v42  ;;  %v1231_v37 = vpop.xlane.xlu0 %1230 }
 0x3e1   :  { %2582 = vrcp.f32 %v1231_v37 }
 0x3e2   :  { %v1380_v54 = vsub.f32 2.0, %v1348_v38 }
 0x3e3   :  { %v2579_v27 = vpop.eup %2578 }
 0x3e4   :  { %v1412_v29 = vmul.f32 %v2577_v21, %v1380_v54  ;;  %v1349_v20 = vmul.f32 %v2579_v27, %v1225_v44  ;;  %v1234_v45 = vpop.xlane.xlu0 %1233 }
 0x3e5   :  { %2584 = vrcp.f32 %v1234_v45 }
 0x3e6   :  { %v1444_v5 = vmul.f32 %v3432_v60, %v1412_v29  ;;  %v1381_v52 = vsub.f32 2.0, %v1349_v20  ;;  %v1445_v9 = vmul.f32 %v3434_v58, %v1412_v29 }
 0x3e7   :  { %v2581_v48 = vpop.eup %2580 }
 0x3e8   :  { %v1413_v7 = vmul.f32 %v2579_v27, %v1381_v52  ;;  %v1350_v55 = vmul.f32 %v2581_v48, %v1228_v13  ;;  %1668 = vmatprep.mubr.f32.mxu0 %v1445_v9  ;;  %v1237_v11 = vpop.xlane.xlu0 %1236 }
 0x3e9   :  { %2586 = vrcp.f32 %v1237_v11  ;;  %1669 = vmatmul.mubr.f32.vlgmr.msra.gmra.mrb[32].mxu0 %v1444_v5 }
 0x3ea   :  { %v1382_v42 = vsub.f32 2.0, %v1350_v55  ;;  %v1447_v38 = vmul.f32 %v3442_v62, %v1413_v7  ;;  %v1446_v21 = vmul.f32 %v3440_v14, %v1413_v7 }
 0x3eb   :  { %v2583_v44 = vpop.eup %2582 }
 0x3ec   :  { %v1414_v54 = vmul.f32 %v2581_v48, %v1382_v42  ;;  %v1351_v59 = vmul.f32 %v2583_v44, %v1231_v37  ;;  %v1240_v19 = vpop.xlane.xlu0 %1239  ;;  %1673 = vmatprep.mubr.f32.mxu0 %v1447_v38 }
 0x3ed   :  { %2588 = vrcp.f32 %v1240_v19  ;;  %1674 = vmatmul.mubr.f32.gmra.mrb[34].mxu0 %v1446_v21 }
 0x3ee   :  { %v1383_v60 = vsub.f32 2.0, %v1351_v59  ;;  %v1449_v58 = vmul.f32 %v3450_v50, %v1414_v54  ;;  %v1448_v27 = vmul.f32 %v3448_v43, %v1414_v54 }
 0x3ef   :  { %v2585_v52 = vpop.eup %2584 }
 0x3f0   :  { %v1415_v29 = vmul.f32 %v2583_v44, %v1383_v60  ;;  %v1352_v5 = vmul.f32 %v2585_v52, %v1234_v45  ;;  %v1243_v55 = vpop.xlane.xlu0 %1242  ;;  %1678 = vmatprep.mubr.f32.mxu0 %v1449_v58 }
 0x3f1   :  { %2590 = vrcp.f32 %v1243_v55  ;;  %1679 = vmatmul.mubr.f32.gmra.mrb[36].mxu0 %v1448_v27 }
 0x3f2   :  { %v1384_v14 = vsub.f32 2.0, %v1352_v5  ;;  %v1451_v62 = vmul.f32 %v3458_v1, %v1415_v29  ;;  %v1450_v37 = vmul.f32 %v3456_v6, %v1415_v29 }
 0x3f3   :  { %v2587_v20 = vpop.eup %2586 }
 0x3f4   :  { %v1416_v13 = vmul.f32 %v2585_v52, %v1384_v14  ;;  %v1353_v9 = vmul.f32 %v2587_v20, %v1237_v11  ;;  %v1246_v59 = vpop.xlane.xlu0 %1245  ;;  %1683 = vmatprep.mubr.f32.mxu0 %v1451_v62 }
 0x3f5   :  { %2592 = vrcp.f32 %v1246_v59  ;;  %1684 = vmatmul.mubr.f32.gmra.mrb[38].mxu0 %v1450_v37 }
 0x3f6   :  { %v1385_v43 = vsub.f32 2.0, %v1353_v9  ;;  %v1453_v50 = vmul.f32 %v3466_v33, %v1416_v13  ;;  %v1452_v45 = vmul.f32 %v3464_v31, %v1416_v13 }
 0x3f7   :  { %v2589_v48 = vpop.eup %2588 }
 0x3f8   :  { %v1417_v7 = vmul.f32 %v2587_v20, %v1385_v43  ;;  %v1354_v42 = vmul.f32 %v2589_v48, %v1240_v19  ;;  %v1249_v38 = vpop.xlane.xlu0 %1248  ;;  %1688 = vmatprep.mubr.f32.mxu0 %v1453_v50 }
 0x3f9   :  { %2594 = vrcp.f32 %v1249_v38  ;;  %1689 = vmatmul.mubr.f32.gmra.mrb[40].mxu0 %v1452_v45 }
 0x3fa   :  { %v1386_v6 = vsub.f32 2.0, %v1354_v42  ;;  %v1455_v1 = vmul.f32 %v3474_v34, %v1417_v7  ;;  %v1454_v11 = vmul.f32 %v3472_v0, %v1417_v7 }
 0x3fb   :  { %v2591_v21 = vpop.eup %2590 }
 0x3fc   :  { %v1418_v44 = vmul.f32 %v2589_v48, %v1386_v6  ;;  %v1355_v54 = vmul.f32 %v2591_v21, %v1243_v55  ;;  %v1252_v60 = vpop.xlane.xlu0 %1251  ;;  %1693 = vmatprep.mubr.f32.mxu0 %v1455_v1 }
 0x3fd   :  { %2596 = vrcp.f32 %v1252_v60  ;;  %1694 = vmatmul.mubr.f32.gmra.mrb[42].mxu0 %v1454_v11 }
 0x3fe   :  { %v1387_v31 = vsub.f32 2.0, %v1355_v54  ;;  %v1457_v33 = vmul.f32 %v3484_v4, %v1418_v44  ;;  %v1456_v19 = vmul.f32 %v3482_v3, %v1418_v44 }
 0x3ff   :  { %v2593_v58 = vpop.eup %2592 }
 0x400   :  { %v1419_v27 = vmul.f32 %v2591_v21, %v1387_v31  ;;  %v1356_v52 = vmul.f32 %v2593_v58, %v1246_v59  ;;  %v1255_v29 = vpop.xlane.xlu0 %1254  ;;  %1698 = vmatprep.mubr.f32.mxu0 %v1457_v33 }
 0x401   :  { %2598 = vrcp.f32 %v1255_v29  ;;  %1699 = vmatmul.mubr.f32.gmra.mrb[44].mxu0 %v1456_v19 }
 0x402   :  { %v1388_v0 = vsub.f32 2.0, %v1356_v52  ;;  %v1459_v34 = vmul.f32 %v3492_v12, %v1419_v27  ;;  %v1458_v5 = vmul.f32 %v3490_v56, %v1419_v27 }
 0x403   :  { %v2595_v55 = vpop.eup %2594 }
 0x404   :  { %v1420_v14 = vmul.f32 %v2593_v58, %v1388_v0  ;;  %v1357_v62 = vmul.f32 %v2595_v55, %v1249_v38  ;;  %v1258_v37 = vpop.xlane.xlu0 %1257  ;;  %1703 = vmatprep.mubr.f32.mxu0 %v1459_v34 }
 0x405   :  { %2600 = vrcp.f32 %v1258_v37  ;;  %1704 = vmatmul.mubr.f32.gmra.mrb[46].mxu0 %v1458_v5 }
 0x406   :  { %v1389_v3 = vsub.f32 2.0, %v1357_v62  ;;  %v1461_v4 = vmul.f32 %v3500_v47, %v1420_v14  ;;  %v1460_v20 = vmul.f32 %v3498_v8, %v1420_v14 }
 0x407   :  { %v2597_v13 = vpop.eup %2596 }
 0x408   :  { %v1421_v9 = vmul.f32 %v2595_v55, %v1389_v3  ;;  %v1358_v59 = vmul.f32 %v2597_v13, %v1252_v60  ;;  %v1261_v43 = vpop.xlane.xlu0 %1260  ;;  %1708 = vmatprep.mubr.f32.mxu0 %v1461_v4 }
 0x409   :  { %2602 = vrcp.f32 %v1261_v43  ;;  %v1024_v12 = vpop.xlane.xlu1 %1023  ;;  %1709 = vmatmul.mubr.f32.gmra.mrb[48].mxu0 %v1460_v20 }
 0x40a   :  { %v1390_v56 = vsub.f32 2.0, %v1358_v59  ;;  %v1088_v50 = vsub.f32 %v3539_v53, %v1024_v12  ;;  %v1089_v45 = vsub.f32 %v3542_v24, %v1024_v12  ;;  %v1463_v48 = vmul.f32 %v3508_v39, %v1421_v9 }
 0x40b   :  { %v2599_v7 = vpop.eup %2598  ;;  %v1462_v47 = vmul.f32 %v3506_v46, %v1421_v9 }
 0x40c   :  { %v1422_v42 = vmul.f32 %v2597_v13, %v1390_v56  ;;  %v1359_v8 = vmul.f32 %v2599_v7, %v1255_v29  ;;  %v1212_v38 = vmul.f32 1.442695, %v1088_v50  ;;  %v1214_v6 = vmul.f32 1.442695, %v1089_v45  ;;  %1713 = vmatprep.mubr.f32.mxu0 %v1463_v48 }
 0x40d   :  { %v1264_v1 = vpop.xlane.xlu1 %1263  ;;  %1714 = vmatmul.mubr.f32.gmra.mrb[50].mxu0 %v1462_v47 }
 0x40e   :  { %v1391_v11 = vsub.f32 2.0, %v1359_v8  ;;  %2604 = vpow2.f32 %v1212_v38  ;;  %v1465_v21 = vmul.f32 %v3516_v17, %v1422_v42  ;;  %v1464_v53 = vmul.f32 %v3514_v28, %v1422_v42 }
 0x40f   :  { %v2601_v44 = vpop.eup %2600  ;;  %2606 = vpow2.f32 %v1214_v6 }
 0x410   :  { %v1423_v24 = vmul.f32 %v2599_v7, %v1391_v11  ;;  %v1360_v39 = vmul.f32 %v2601_v44, %v1258_v37  ;;  %2608 = vrcp.f32 %v1264_v1  ;;  %v1267_v54 = vpop.xlane.xlu0 %1266  ;;  %1718 = vmatprep.mubr.f32.mxu0 %v1465_v21 }
 0x411   :  { %2610 = vrcp.f32 %v1267_v54  ;;  %1719 = vmatmul.mubr.f32.gmra.mrb[52].mxu0 %v1464_v53 }
 0x412   :  { %v1392_v46 = vsub.f32 2.0, %v1360_v39  ;;  %v1467_v60 = vmul.f32 %v3524_v18, %v1423_v24  ;;  %v1466_v31 = vmul.f32 %v3522_v23, %v1423_v24 }
 0x413   :  { %v2603_v33 = vpop.eup %2602 }
 0x414   :  { %v1424_v19 = vmul.f32 %v2601_v44, %v1392_v46  ;;  %v1361_v58 = vmul.f32 %v2603_v33, %v1261_v43  ;;  %1723 = vmatprep.mubr.f32.mxu0 %v1467_v60  ;;  %v1270_v17 = vpop.xlane.xlu1 %1269 }
 0x415   :  { %1724 = vmatmul.mubr.f32.gmra.mrb[54].mxu0 %v1466_v31  ;;  %2612 = vrcp.f32 %v1270_v17 }
 0x416   :  { %v1393_v28 = vsub.f32 2.0, %v1361_v58  ;;  %v1469_v27 = vmul.f32 %v3532_v22, %v1424_v19  ;;  %v1468_v52 = vmul.f32 %v3530_v25, %v1424_v19 }
 0x418   :  { %v3712_v29 = vpop.eup %2604  ;;  %v1425_v0 = vmul.f32 %v2603_v33, %v1393_v28  ;;  %v1273_v34 = vpop.xlane.xlu0 %1272  ;;  %1728 = vmatprep.mubr.f32.mxu0 %v1469_v27  ;;  %v3980_v28 = vld [vmem:[#allocation19_spill] sm:$0xff] }
 0x419   :  { %v3714_v18 = vpop.eup %2606  ;;  %2614 = vrcp.f32 %v1273_v34  ;;  %1729 = vmatmul.mubr.f32.gmra.mrb[56].mxu0 %v1468_v52  ;;  %v3981_v52 = vld [vmem:[#allocation6_spill] sm:$0xff] }
 0x41a   :  { %v2609_v23 = vpop.eup %2608  ;;  %v1310_v5 = vadd.f32 %v3714_v18, %v3712_v29  ;;  %v1471_v55 = vmul.f32 %v3546_v30, %v1425_v0  ;;  %v1470_v14 = vmul.f32 %v3544_v63, %v1425_v0 }
 0x41b   :  { %v2611_v22 = vpop.eup %2610  ;;  %v1362_v62 = vmul.f32 %v2609_v23, %v1264_v1 }
 0x41c   :  { %v1363_v25 = vmul.f32 %v2611_v22, %v1267_v54  ;;  %1311 = vadd.xlane.f32.xlu1 %v1310_v5  ;;  %v1276_v37 = vpop.xlane.xlu1 %1275  ;;  %1733 = vmatprep.mubr.f32.mxu0 %v1471_v55 }
 0x41d   :  { %v1394_v3 = vsub.f32 2.0, %v1362_v62  ;;  %2616 = vrcp.f32 %v1276_v37  ;;  %1734 = vmatmul.mubr.f32.gmra.mrb[58].mxu0 %v1470_v14 }
 0x41e   :  { %v1395_v4 = vsub.f32 2.0, %v1363_v25 }
 0x41f   :  { %v1426_v20 = vmul.f32 %v2609_v23, %v1394_v3  ;;  %v2613_v13 = vpop.eup %2612 }
 0x420   :  { %v1427_v9 = vmul.f32 %v2611_v22, %v1395_v4  ;;  %v1279_v59 = vpop.xlane.xlu0 %1278  ;;  %v1364_v43 = vmul.f32 %v2613_v13, %v1270_v17  ;;  %v3979_v17 = vld [vmem:[#allocation5_spill] sm:$0xff] }
 0x421   :  { %2618 = vrcp.f32 %v1279_v59  ;;  %v1473_v30 = vmul.f32 %v3556_v41, %v1426_v20  ;;  %v1472_v63 = vmul.f32 %v3554_v36, %v1426_v20 }
 0x422   :  { %v1475_v12 = vmul.f32 %v3564_v32, %v1427_v9  ;;  %v1396_v50 = vsub.f32 2.0, %v1364_v43  ;;  %v1474_v42 = vmul.f32 %v3562_v57, %v1427_v9 }
 0x423   :  { %v2615_v56 = vpop.eup %2614  ;;  %1738 = vmatprep.mubr.f32.mxu0 %v1473_v30 }
 0x424   :  { %v1365_v45 = vmul.f32 %v2615_v56, %v1273_v34  ;;  %1739 = vmatmul.mubr.f32.gmra.mrb[60].mxu0 %v1472_v63  ;;  %v1282_v48 = vpop.xlane.xlu1 %1281  ;;  %v1428_v7 = vmul.f32 %v2613_v13, %v1396_v50  ;;  %v3982_v34 = vld [vmem:[#allocation21_spill] sm:$0xff] }
 0x425   :  { %2620 = vrcp.f32 %v1282_v48  ;;  %1743 = vmatprep.mubr.f32.mxu0 %v1475_v12 }
 0x426   :  { %v1397_v47 = vsub.f32 2.0, %v1365_v45  ;;  %v1477_v38 = vmul.f32 %v3572_v10, %v1428_v7  ;;  %v1476_v1 = vmul.f32 %v3570_v35, %v1428_v7 }
 0x427   :  { %v2617_v8 = vpop.eup %2616 }
 0x428   :  { %v1429_v41 = vmul.f32 %v2615_v56, %v1397_v47  ;;  %v1366_v6 = vmul.f32 %v2617_v8, %v1276_v37  ;;  %1744 = vmatmul.mubr.f32.gmra.mrb[62].mxu0 %v1474_v42  ;;  %v1285_v36 = vpop.xlane.xlu0 %1284 }
 0x429   :  { %2622 = vrcp.f32 %v1285_v36  ;;  %1748 = vmatprep.mubr.f32.mxu0 %v1477_v38 }
 0x42a   :  { %v1398_v32 = vsub.f32 2.0, %v1366_v6  ;;  %v1479_v11 = vmul.f32 %v3580_v61, %v1429_v41  ;;  %v1478_v24 = vmul.f32 %v3578_v49, %v1429_v41 }
 0x42b   :  { %v2619_v21 = vpop.eup %2618 }
 0x42c   :  { %v1430_v53 = vmul.f32 %v2617_v8, %v1398_v32  ;;  %v1367_v44 = vmul.f32 %v2619_v21, %v1279_v59  ;;  %1749 = vmatmul.mubr.f32.gmra.mrb[64].mxu0 %v1476_v1 }
 0x42d   :  { %1753 = vmatprep.mubr.f32.mxu0 %v1479_v11  ;;  %v3984_v11 = vld [vmem:[#allocation10_spill] sm:$0xff] }
 0x42e   :  { %v1399_v57 = vsub.f32 2.0, %v1367_v44  ;;  %v1481_v10 = vmul.f32 %v3589_v15, %v1430_v53  ;;  %v1480_v35 = vmul.f32 %v3586_v51, %v1430_v53  ;;  %v3983_v51 = vld [vmem:[#allocation20_spill] sm:$0xff] }
 0x42f   :  { %v2621_v39 = vpop.eup %2620 }
 0x430   :  { %v1431_v54 = vmul.f32 %v2619_v21, %v1399_v57  ;;  %v1368_v46 = vmul.f32 %v2621_v39, %v1282_v48  ;;  %1754 = vmatmul.mubr.f32.gmra.mrb[66].mxu0 %v1478_v24  ;;  %v1291_v5 = vpop.xlane.xlu0 %1290  ;;  %v3985_v24 = vld [vmem:[#allocation18_spill] sm:$0xff] }
 0x431   :  { %1758 = vmatprep.mubr.f32.mxu0 %v1481_v10  ;;  %2624 = vrcp.f32 %v1291_v5  ;;  %v3986_v10 = vld [vmem:[#allocation9_spill] sm:$0xff] }
 0x432   :  { %v1400_v60 = vsub.f32 2.0, %v1368_v46  ;;  %v1483_v61 = vmul.f32 %v3596_v2, %v1431_v54  ;;  %v1482_v49 = vmul.f32 %v3979_v17, %v1431_v54 }
 0x433   :  { %v2623_v31 = vpop.eup %2622 }
 0x434   :  { %v1432_v33 = vmul.f32 %v2621_v39, %v1400_v60  ;;  %v1369_v19 = vmul.f32 %v2623_v31, %v1285_v36  ;;  %1759 = vmatmul.mubr.f32.gmra.mrb[68].mxu0 %v1480_v35  ;;  %v3987_v60 = vld [vmem:[#allocation12_spill] sm:$0xff] }
 0x435   :  { %1763 = vmatprep.mubr.f32.mxu0 %v1483_v61 }
 0x436   :  { %v1401_v58 = vsub.f32 2.0, %v1369_v19  ;;  %v1485_v15 = vmul.f32 %v3980_v28, %v1432_v33  ;;  %v1484_v0 = vmul.f32 %v3981_v52, %v1432_v33 }
 0x438   :  { %v1433_v27 = vmul.f32 %v2623_v31, %v1401_v58  ;;  %1764 = vmatmul.mubr.f32.gmra.mrb[70].mxu0 %v1482_v49  ;;  %v1297_v55 = vpop.xlane.xlu0 %1296  ;;  %v3988_v31 = vld [vmem:[#allocation11_spill] sm:$0xff] }
 0x439   :  { %1768 = vmatprep.mubr.f32.mxu0 %v1485_v15  ;;  %v3990_v15 = vld [vmem:[#allocation13_spill] sm:$0xff] }
 0x43a   :  { %v1487_v23 = vmul.f32 %v3982_v34, %v1433_v27  ;;  %v1486_v2 = vmul.f32 %v3983_v51, %v1433_v27 }
 0x43b   :  { %v2625_v3 = vpop.eup %2624 }
 0x43c   :  { %1769 = vmatmul.mubr.f32.gmra.mrb[72].mxu0 %v1484_v0  ;;  %v1371_v4 = vmul.f32 %v2625_v3, %v1291_v5 }
 0x43d   :  { %1773 = vmatprep.mubr.f32.mxu0 %v1487_v23  ;;  %v3991_v23 = vld [vmem:[#allocation15_spill] sm:$0xff] }
 0x43e   :  { %v1403_v9 = vsub.f32 2.0, %v1371_v4 }
 0x440   :  { %1774 = vmatmul.mubr.f32.gmra.mrb[74].mxu0 %v1486_v2  ;;  %v1303_v14 = vpop.xlane.xlu0 %1302  ;;  %v1435_v50 = vmul.f32 %v2625_v3, %v1403_v9  ;;  %v3992_v2 = vld [vmem:[#allocation14_spill] sm:$0xff] }
 0x442   :  { %v1491_v21 = vmul.f32 %v3984_v11, %v1435_v50 }
 0x448   :  { %v3736_v22 = vpop.xlane.xlu0 %1308 }
 0x455   :  { %v1288_v62 = vpop.xlane.xlu1 %1287 }
 0x456   :  { %2626 = vrcp.f32 %v1288_v62 }
 0x457   :  { %2628 = vrcp.f32 %v1297_v55 }
 0x459   :  { %v1294_v25 = vpop.xlane.xlu1 %1293  ;;  %v1315_v37 = vpop.xlane.xlu0 %1314 }
 0x45a   :  { %2630 = vrcp.f32 %v1294_v25 }
 0x45b   :  { %2632 = vrcp.f32 %v1315_v37 }
 0x45d   :  { %v1300_v20 = vpop.xlane.xlu1 %1299 }
 0x45e   :  { %2634 = vrcp.f32 %v1300_v20 }
 0x45f   :  { %2636 = vrcp.f32 %v1303_v14 }
 0x460   :  { %v2627_v13 = vpop.eup %2626 }
 0x461   :  { %v1370_v59 = vmul.f32 %v2627_v13, %v1288_v62  ;;  %v1306_v43 = vpop.xlane.xlu1 %1305  ;;  %v2629_v30 = vpop.eup %2628  ;;  %v3993_v62 = vld [vmem:[#allocation17_spill] sm:$0xff] }
 0x462   :  { %2638 = vrcp.f32 %v1306_v43  ;;  %v1373_v45 = vmul.f32 %v2629_v30, %v1297_v55 }
 0x463   :  { %v1402_v63 = vsub.f32 2.0, %v1370_v59  ;;  %2640 = vrcp.f32 %v3736_v22  ;;  %v3997_v59 = vld [vmem:[#allocation8_spill] sm:$0xff] }
 0x464   :  { %v2631_v12 = vpop.eup %2630  ;;  %v1405_v36 = vsub.f32 2.0, %v1373_v45 }
 0x465   :  { %v2633_v56 = vpop.eup %2632  ;;  %v1434_v48 = vmul.f32 %v2627_v13, %v1402_v63  ;;  %v1372_v7 = vmul.f32 %v2631_v12, %v1294_v25 }
 0x466   :  { %v1379_v47 = vmul.f32 %v2633_v56, %v1315_v37  ;;  %v1437_v39 = vmul.f32 %v2629_v30, %v1405_v36  ;;  %v3994_v37 = vld [vmem:[#allocation16_spill] sm:$0xff]  ;;  %v3998_v30 = vld [vmem:[#allocation7_spill] sm:$0xff] }
 0x467   :  { %v1404_v42 = vsub.f32 2.0, %v1372_v7  ;;  %v1489_v8 = vmul.f32 %v3658_v40, %v1434_v48  ;;  %v1488_v38 = vmul.f32 %v3656_v16, %v1434_v48  ;;  %v1490_v16 = vmul.f32 %v3986_v10, %v1435_v50 }
 0x468   :  { %v2635_v41 = vpop.eup %2634  ;;  %v1411_v6 = vsub.f32 2.0, %v1379_v47  ;;  %v1494_v27 = vmul.f32 %v3990_v15, %v1437_v39 }
 0x469   :  { %v1436_v32 = vmul.f32 %v2631_v12, %v1404_v42  ;;  %v1374_v1 = vmul.f32 %v2635_v41, %v1300_v20  ;;  %1778 = vmatprep.mubr.f32.mxu0 %v1489_v8  ;;  %v2637_v53 = vpop.eup %2636  ;;  %v3995_v20 = vld [vmem:[#allocation24_spill] sm:$0xff] }
 0x46a   :  { %v1443_v44 = vmul.f32 %v2633_v56, %v1411_v6  ;;  %1779 = vmatmul.mubr.f32.gmra.mrb[76].mxu0 %v1488_v38  ;;  %v1375_v54 = vmul.f32 %v2637_v53, %v1303_v14 }
 0x46b   :  { %1783 = vmatprep.mubr.f32.mxu0 %v1491_v21  ;;  %v1406_v46 = vsub.f32 2.0, %v1374_v1  ;;  %v1493_v35 = vmul.f32 %v3987_v60, %v1436_v32  ;;  %v1492_v33 = vmul.f32 %v3988_v31, %v1436_v32 }
 0x46c   :  { %v1506_v57 = vmul.f32 %v3664_v26, %v1443_v44  ;;  %v1507_v40 = vmul.f32 %v3985_v24, %v1443_v44  ;;  %v2639_v61 = vpop.eup %2638  ;;  %v1407_v19 = vsub.f32 2.0, %v1375_v54  ;;  %v3989_v26 = vld [vmem:[#allocation22_spill] sm:$0xff] }
 0x46d   :  { %v1438_v58 = vmul.f32 %v2635_v41, %v1406_v46  ;;  %v1376_v17 = vmul.f32 %v2639_v61, %v1306_v43  ;;  %v1495_v49 = vmul.f32 %v3989_v26, %v1437_v39  ;;  %v2641_v28 = vpop.eup %2640 }
 0x46e   :  { %1823 = vmatprep.mubr.f32.mxu1 %v1507_v40  ;;  %1784 = vmatmul.mubr.f32.gmra.mrb[78].mxu0 %v1490_v16  ;;  %v1439_v52 = vmul.f32 %v2637_v53, %v1407_v19  ;;  %v1377_v0 = vmul.f32 %v2641_v28, %v3736_v22  ;;  %v3996_v22 = vld [vmem:[#allocation23_spill] sm:$0xff] }
 0x46f   :  { %1824 = vmatmul.mubr.f32.vlgmr.msra.gmra.mrb[64].mxu1 %v1506_v57  ;;  %1788 = vmatprep.mubr.f32.mxu0 %v1493_v35  ;;  %v1408_v34 = vsub.f32 2.0, %v1376_v17  ;;  %v1497_v51 = vmul.f32 %v3991_v23, %v1438_v58  ;;  %v1496_v5 = vmul.f32 %v3992_v2, %v1438_v58 }
 0x470   :  { %v1409_v55 = vsub.f32 2.0, %v1377_v0  ;;  %v1499_v25 = vmul.f32 %v3993_v62, %v1439_v52  ;;  %v1498_v3 = vmul.f32 %v3994_v37, %v1439_v52 }
 0x471   :  { %v1440_v14 = vmul.f32 %v2639_v61, %v1408_v34 }
 0x472   :  { %1789 = vmatmul.mubr.f32.gmra.mrb[80].mxu0 %v1492_v33  ;;  %v1441_v4 = vmul.f32 %v2641_v28, %v1409_v55 }
 0x473   :  { %1793 = vmatprep.mubr.f32.mxu0 %v1495_v49  ;;  %v1501_v13 = vmul.f32 %v3995_v20, %v1440_v14  ;;  %v1500_v9 = vmul.f32 %v3996_v22, %v1440_v14 }
 0x474   :  { %v1503_v43 = vmul.f32 %v3997_v59, %v1441_v4  ;;  %v1502_v63 = vmul.f32 %v3998_v30, %v1441_v4 }
 0x476   :  { %1794 = vmatmul.mubr.f32.gmra.mrb[82].mxu0 %v1494_v27 }
 0x477   :  { %1798 = vmatprep.mubr.f32.mxu0 %v1497_v51 }
 0x47a   :  { %1799 = vmatmul.mubr.f32.gmra.mrb[84].mxu0 %v1496_v5 }
 0x47b   :  { %1803 = vmatprep.mubr.f32.mxu0 %v1499_v25 }
 0x47e   :  { %1804 = vmatmul.mubr.f32.gmra.mrb[86].mxu0 %v1498_v3 }
 0x47f   :  { %1808 = vmatprep.mubr.f32.mxu0 %v1501_v13 }
 0x482   :  { %1809 = vmatmul.mubr.f32.gmra.mrb[88].mxu0 %v1500_v9 }
 0x483   :  { %1813 = vmatprep.mubr.f32.mxu0 %v1503_v43 }
 0x486   :  { %1814 = vmatmul.mubr.f32.gmra.mrb[90].mxu0 %v1502_v63 }
 0x4a9   :  { %v1312_v12 = vpop.xlane.xlu1 %1311 }
 0x4aa   :  { %2642 = vrcp.f32 %v1312_v12 }
 0x4b4   :  { %v2643_v56 = vpop.eup %2642 }
 0x4b5   :  { %v1378_v50 = vmul.f32 %v2643_v56, %v1312_v12 }
 0x4b7   :  { %v1410_v45 = vsub.f32 2.0, %v1378_v50 }
 0x4b9   :  { %v1442_v48 = vmul.f32 %v2643_v56, %v1410_v45 }
 0x4bb   :  { %v1505_v7 = vmul.f32 %v3714_v18, %v1442_v48  ;;  %v1504_v47 = vmul.f32 %v3712_v29, %v1442_v48 }
 0x4bc   :  { %v1670_v42 = vpop.f32.mrb[32].mxu0 }
 0x4bd   :  { %1829 = vst.msk [vmem:[%s3891_s3] sm:$0xff] %vm546_vm1, %v1670_v42  ;;  %1818 = vmatprep.mubr.f32.mxu0 %v1505_v7  ;;  %v1672_v8 = vpop.f32.mrb[33].mxu0 }
 0x4be   :  { %1819 = vmatmul.mubr.f32.gmra.mrb[92].mxu0 %v1504_v47 }
 0x4c0   :  { %v1675_v38 = vpop.f32.mrb[34].mxu0 }
 0x4c1   :  { %1830 = vst.msk [vmem:[%s3891_s3 + $0x8] sm:$0xff] %vm546_vm1, %v1675_v38  ;;  %v1677_v41 = vpop.f32.mrb[35].mxu0 }
 0x4c4   :  { %v1680_v6 = vpop.f32.mrb[36].mxu0 }
 0x4c5   :  { %1831 = vst.msk [vmem:[%s3891_s3 + $0x10] sm:$0xff] %vm546_vm1, %v1680_v6  ;;  %v1682_v29 = vpop.f32.mrb[37].mxu0 }
 0x4c8   :  { %v1685_v18 = vpop.f32.mrb[38].mxu0 }
 0x4c9   :  { %1832 = vst.msk [vmem:[%s3891_s3 + $0x18] sm:$0xff] %vm546_vm1, %v1685_v18  ;;  %v1687_v36 = vpop.f32.mrb[39].mxu0 }
 0x4cc   :  { %v1690_v32 = vpop.f32.mrb[40].mxu0 }
 0x4cd   :  { %1833 = vst.msk [vmem:[%s3891_s3 + $0x20] sm:$0xff] %vm546_vm1, %v1690_v32  ;;  %v1692_v1 = vpop.f32.mrb[41].mxu0 }
 0x4d0   :  { %v1695_v11 = vpop.f32.mrb[42].mxu0 }
 0x4d1   :  { %1834 = vst.msk [vmem:[%s3891_s3 + $0x28] sm:$0xff] %vm546_vm1, %v1695_v11  ;;  %v1697_v21 = vpop.f32.mrb[43].mxu0 }
 0x4d4   :  { %v1700_v53 = vpop.f32.mrb[44].mxu0 }
 0x4d5   :  { %1835 = vst.msk [vmem:[%s3891_s3 + $0x30] sm:$0xff] %vm546_vm1, %v1700_v53  ;;  %v1702_v44 = vpop.f32.mrb[45].mxu0 }
 0x4d8   :  { %v1705_v57 = vpop.f32.mrb[46].mxu0 }
 0x4d9   :  { %1836 = vst.msk [vmem:[%s3891_s3 + $0x38] sm:$0xff] %vm546_vm1, %v1705_v57  ;;  %v1707_v24 = vpop.f32.mrb[47].mxu0 }
 0x4dc   :  { %v1710_v40 = vpop.f32.mrb[48].mxu0 }
 0x4dd   :  { %1837 = vst.msk [vmem:[%s3891_s3 + $0x40] sm:$0xff] %vm546_vm1, %v1710_v40  ;;  %v1712_v10 = vpop.f32.mrb[49].mxu0 }
 0x4e0   :  { %v1715_v16 = vpop.f32.mrb[50].mxu0 }
 0x4e1   :  { %1838 = vst.msk [vmem:[%s3891_s3 + $0x48] sm:$0xff] %vm546_vm1, %v1715_v16  ;;  %v1717_v39 = vpop.f32.mrb[51].mxu0 }
 0x4e4   :  { %v1720_v54 = vpop.f32.mrb[52].mxu0 }
 0x4e5   :  { %1839 = vst.msk [vmem:[%s3891_s3 + $0x50] sm:$0xff] %vm546_vm1, %v1720_v54  ;;  %v1722_v46 = vpop.f32.mrb[53].mxu0 }
 0x4e8   :  { %v1725_v60 = vpop.f32.mrb[54].mxu0 }
 0x4e9   :  { %1840 = vst.msk [vmem:[%s3891_s3 + $0x58] sm:$0xff] %vm546_vm1, %v1725_v60  ;;  %v1727_v35 = vpop.f32.mrb[55].mxu0 }
 0x4ec   :  { %v1730_v61 = vpop.f32.mrb[56].mxu0 }
 0x4ed   :  { %1841 = vst.msk [vmem:[%s3891_s3 + $0x60] sm:$0xff] %vm546_vm1, %v1730_v61  ;;  %v1732_v31 = vpop.f32.mrb[57].mxu0 }
 0x4f0   :  { %v1735_v33 = vpop.f32.mrb[58].mxu0 }
 0x4f1   :  { %1842 = vst.msk [vmem:[%s3891_s3 + $0x68] sm:$0xff] %vm546_vm1, %v1735_v33  ;;  %v1737_v19 = vpop.f32.mrb[59].mxu0 }
 0x4f7   :  { %v1740_v58 = vpop.f32.mrb[60].mxu0 }
 0x4f8   :  { %1843 = vst.msk [vmem:[%s3891_s3 + $0x70] sm:$0xff] %vm546_vm1, %v1740_v58  ;;  %v1742_v17 = vpop.f32.mrb[61].mxu0 }
 0x4fb   :  { %v1745_v26 = vpop.f32.mrb[62].mxu0 }
 0x4fc   :  { %1844 = vst.msk [vmem:[%s3891_s3 + $0x78] sm:$0xff] %vm546_vm1, %v1745_v26  ;;  %v1747_v49 = vpop.f32.mrb[63].mxu0 }
 0x4ff   :  { %v1750_v28 = vpop.f32.mrb[64].mxu0 }
 0x500   :  { %1845 = vst.msk [vmem:[%s3891_s3 + $0x80] sm:$0xff] %vm546_vm1, %v1750_v28  ;;  %v1752_v15 = vpop.f32.mrb[65].mxu0 }
 0x503   :  { %v1755_v27 = vpop.f32.mrb[66].mxu0 }
 0x504   :  { %1846 = vst.msk [vmem:[%s3891_s3 + $0x88] sm:$0xff] %vm546_vm1, %v1755_v27  ;;  %v1757_v52 = vpop.f32.mrb[67].mxu0 }
 0x507   :  { %v1760_v0 = vpop.f32.mrb[68].mxu0 }
 0x508   :  { %1847 = vst.msk [vmem:[%s3891_s3 + $0x90] sm:$0xff] %vm546_vm1, %v1760_v0  ;;  %v1762_v34 = vpop.f32.mrb[69].mxu0 }
 0x50b   :  { %v1765_v23 = vpop.f32.mrb[70].mxu0 }
 0x50c   :  { %1848 = vst.msk [vmem:[%s3891_s3 + $0x98] sm:$0xff] %vm546_vm1, %v1765_v23  ;;  %v1767_v51 = vpop.f32.mrb[71].mxu0 }
 0x50f   :  { %v1770_v2 = vpop.f32.mrb[72].mxu0 }
 0x510   :  { %1849 = vst.msk [vmem:[%s3891_s3 + $0xa0] sm:$0xff] %vm546_vm1, %v1770_v2  ;;  %v1772_v5 = vpop.f32.mrb[73].mxu0 }
 0x513   :  { %v1775_v55 = vpop.f32.mrb[74].mxu0 }
 0x514   :  { %1850 = vst.msk [vmem:[%s3891_s3 + $0xa8] sm:$0xff] %vm546_vm1, %v1775_v55  ;;  %v1777_v14 = vpop.f32.mrb[75].mxu0 }
 0x53d   :  { %v1780_v62 = vpop.f32.mrb[76].mxu0 }
 0x53e   :  { %1851 = vst.msk [vmem:[%s3891_s3 + $0xb0] sm:$0xff] %vm546_vm1, %v1780_v62  ;;  %v1782_v25 = vpop.f32.mrb[77].mxu0 }
 0x541   :  { %v1785_v37 = vpop.f32.mrb[78].mxu0 }
 0x542   :  { %1852 = vst.msk [vmem:[%s3891_s3 + $0xb8] sm:$0xff] %vm546_vm1, %v1785_v37  ;;  %v1825_v3 = vpop.f32.mrb[64].mxu1  ;;  %v1787_v4 = vpop.f32.mrb[79].mxu0 }
 0x543   :  { %1860 = vst.msk [vmem:[%s3891_s3 + $0xf8] sm:$0xff] %vm546_vm1, %v1825_v3  ;;  %v1827_v20 = vpop.f32.mrb[65].mxu1 }
 0x545   :  { %v1790_v13 = vpop.f32.mrb[80].mxu0 }
 0x546   :  { %1853 = vst.msk [vmem:[%s3891_s3 + $0xc0] sm:$0xff] %vm546_vm1, %v1790_v13  ;;  %v1792_v22 = vpop.f32.mrb[81].mxu0 }
 0x549   :  { %v1795_v9 = vpop.f32.mrb[82].mxu0 }
 0x54a   :  { %1854 = vst.msk [vmem:[%s3891_s3 + $0xc8] sm:$0xff] %vm546_vm1, %v1795_v9  ;;  %v1797_v59 = vpop.f32.mrb[83].mxu0 }
 0x54d   :  { %v1800_v43 = vpop.f32.mrb[84].mxu0 }
 0x54e   :  { %1855 = vst.msk [vmem:[%s3891_s3 + $0xd0] sm:$0xff] %vm546_vm1, %v1800_v43  ;;  %v1802_v30 = vpop.f32.mrb[85].mxu0 }
 0x551   :  { %v1805_v63 = vpop.f32.mrb[86].mxu0 }
 0x552   :  { %1856 = vst.msk [vmem:[%s3891_s3 + $0xd8] sm:$0xff] %vm546_vm1, %v1805_v63  ;;  %v1807_v12 = vpop.f32.mrb[87].mxu0 }
 0x555   :  { %v1810_v56 = vpop.f32.mrb[88].mxu0 }
 0x556   :  { %1857 = vst.msk [vmem:[%s3891_s3 + $0xe0] sm:$0xff] %vm546_vm1, %v1810_v56  ;;  %v1812_v50 = vpop.f32.mrb[89].mxu0 }
 0x559   :  { %v1815_v45 = vpop.f32.mrb[90].mxu0 }
 0x55a   :  { %1858 = vst.msk [vmem:[%s3891_s3 + $0xe8] sm:$0xff] %vm546_vm1, %v1815_v45  ;;  %v1817_v48 = vpop.f32.mrb[91].mxu0 }
 0x591   :  { %v1820_v7 = vpop.f32.mrb[92].mxu0 }
 0x592   :  { %1859 = vst.msk [vmem:[%s3891_s3 + $0xf0] sm:$0xff] %vm546_vm1, %v1820_v7  ;;  %v1822_v47 = vpop.f32.mrb[93].mxu0 }
 0x593   :  { %1865 = vsyncpa [#allocation3], 1 }

</bundles_post_ra>
